<compile_context>
chip_gen: v7x
topology: tpu7x:2x2x1
jax: 0.10.0
libtpu: 0.0.40
codegen_flags: <defaults>
</compile_context>

<pallas_src>
import functools
import math

import jax
import jax.numpy as jnp
from jax import lax
from jax.experimental import pallas as pl
from jax.experimental.pallas import tpu as pltpu


# ---------------------------------------------------------------------------
# helpers
# ---------------------------------------------------------------------------
def _tpu_vmem_capacity():
    try:
        info = pltpu.get_tpu_info()
        return int(getattr(info, "vmem_capacity_bytes", 64 << 20))
    except Exception:
        return 64 << 20


def _pick_tile(n, target, mult):
    """Largest divisor of n that is a multiple of `mult` and <= target, else n."""
    if n <= target:
        return n
    t = target - (target % mult)
    while t >= mult:
        if n % t == 0:
            return t
        t -= mult
    return n


# ---------------------------------------------------------------------------
# Kernel 1: fused RMSNorm + QKV projection + rotary (head-pair packed)
# ---------------------------------------------------------------------------
def _rmsnorm_qkv_rope_kernel(x_ref, g_ref, w_ref, cos_ref, sin_ref,
                             q_ref, k_ref, v_ref, *, eps, dh, pack, hg,
                             has_rotary):
    G = pack * dh
    x = x_ref[0].astype(jnp.float32)                                   # (tn, D)
    inv = lax.rsqrt(jnp.mean(x * x, axis=-1, keepdims=True) + eps)
    xn = (x * inv * g_ref[...].astype(jnp.float32)).astype(w_ref.dtype)

    # One wide MXU matmul per grid step; f32 accumulation.
    qkv = jnp.dot(xn, w_ref[0], preferred_element_type=jnp.float32)    # (tn, hg*3*G)

    if has_rotary:
        cos = cos_ref[...]                                             # (tn, G)
        sin = sin_ref[...]                                             # sign-folded sin
        lane = lax.broadcasted_iota(jnp.int32, (cos.shape[0], G), 1)
        half = dh // 2
        if (half & (half - 1)) == 0:                                   # power of two
            first_half = (lane & half) == 0
        else:
            first_half = (lane % dh) < half

        def rot(t):
            # within-head rotate_half (unsigned; sign folded into `sin`):
            # per 2*half-wide head [a, b] -> [b, a], done for both packed heads
            # with two XLU rolls + one lane select (no 64-lane slicing).
            pos = pltpu.roll(t, shift=half, axis=1)
            neg = pltpu.roll(t, shift=(G - half) % G, axis=1)
            return jnp.where(first_half, neg, pos)

    for j in range(hg):                                                # static unroll
        base = j * 3 * G
        q = qkv[:, base: base + G]          # 128-lane aligned slabs
        k = qkv[:, base + G: base + 2 * G]
        v = qkv[:, base + 2 * G: base + 3 * G]
        if has_rotary:
            q = q * cos + rot(q) * sin      # query scale already folded into W
            k = k * cos + rot(k) * sin
        q_ref[0, j] = q.astype(q_ref.dtype)
        k_ref[0, j] = k.astype(k_ref.dtype)
        v_ref[0, j] = v.astype(v_ref.dtype)


# ---------------------------------------------------------------------------
# Kernel 2: flash attention over a scalar-prefetched causal block schedule
# ---------------------------------------------------------------------------
def _flash_attn_kernel(qi_ref, kv_ref, q_ref, k_ref, v_ref, o_ref,
                       m_ref, l_ref, acc_ref, *, block_q, block_k, dh, pack):
    s_idx = pl.program_id(2)
    qi = qi_ref[s_idx]
    kv = kv_ref[s_idx]

    @pl.when(kv == 0)
    def _init():
        m_ref[...] = jnp.full(m_ref.shape, -jnp.inf, dtype=jnp.float32)
        l_ref[...] = jnp.zeros(l_ref.shape, jnp.float32)
        acc_ref[...] = jnp.zeros(acc_ref.shape, jnp.float32)

    q_start = qi * block_q
    k_start = kv * block_k

    def _step(masked):
        q = q_ref[0, 0]                                                # (bq, G) bf16
        k = k_ref[0, 0]                                                # (bk, G)
        v = v_ref[0, 0]                                                # (bk, G)
        if masked:
            row = q_start + lax.broadcasted_iota(jnp.int32, (block_q, block_k), 0)
            col = k_start + lax.broadcasted_iota(jnp.int32, (block_q, block_k), 1)
            bias = jnp.where(col > row, -jnp.finfo(jnp.float32).max, 0.0)
        for h in range(pack):                                          # static unroll
            lo, hi = h * dh, (h + 1) * dh
            s = lax.dot_general(q[:, lo:hi], k[:, lo:hi],
                                (((1,), (1,)), ((), ())),
                                preferred_element_type=jnp.float32)    # (bq, bk)
            if masked:
                s = s + bias
            m_prev = m_ref[h]
            m_new = jnp.maximum(m_prev, jnp.max(s, axis=-1, keepdims=True))
            alpha = jnp.exp(m_prev - m_new)
            p = jnp.exp(s - m_new)
            l_ref[h] = alpha * l_ref[h] + jnp.sum(p, axis=-1, keepdims=True)
            acc_ref[h] = alpha * acc_ref[h] + jnp.dot(
                p.astype(v.dtype), v[:, lo:hi], preferred_element_type=jnp.float32)
            m_ref[h] = m_new

    # Only diagonal-straddling blocks pay for the mask construction.
    needs_mask = (k_start + block_k - 1) > q_start

    @pl.when(needs_mask)
    def _masked():
        _step(True)

    @pl.when(jnp.logical_not(needs_mask))
    def _unmasked():
        _step(False)

    last_kv = (q_start + block_q - 1) // block_k

    @pl.when(kv == last_kv)
    def _finalize():
        parts = []
        for h in range(pack):
            l = l_ref[h]
            inv = pl.reciprocal(l, approx=True)        # EUP slot
            inv = inv * (2.0 - l * inv)                # one Newton step -> ~f32 exact
            parts.append(acc_ref[h] * inv)
        out = parts[0] if pack == 1 else jnp.concatenate(parts, axis=-1)
        o_ref[0] = out.astype(o_ref.dtype)             # (bq, G) lane-dense store


# ---------------------------------------------------------------------------
# Kernel 3: output projection, single full-depth matmul per (b, seq-tile)
# ---------------------------------------------------------------------------
def _out_proj_kernel(a_ref, w_ref, o_ref):
    o_ref[0] = jnp.dot(a_ref[0], w_ref[...],
                       preferred_element_type=jnp.float32).astype(o_ref.dtype)


# ---------------------------------------------------------------------------
# Wrapper
# ---------------------------------------------------------------------------
def attention_forward(x, params, rotary_emb=None, *, heads, dim_head,
                      seq_block=None, block_q=None, block_k=None,
                      compute_dtype=jnp.bfloat16, qkv_weight_budget=8 << 20):
    B, N, D = x.shape
    H, Dh = heads, dim_head
    eps = float(jnp.finfo(x.dtype).eps)         # PyTorch RMSNorm(eps=None) default
    scale = Dh ** -0.5

    pack = 2 if (H % 2 == 0 and 2 * Dh <= 128) else 1   # heads packed per 128-lane slab
    HP = H // pack
    G = pack * Dh

    # generation-aware budgets (v7x: 64 MiB physical; v5e/v6e: 128 MiB)
    cap = _tpu_vmem_capacity()
    big_vmem = cap >= (128 << 20)
    vmem_limit = (100 << 20) if big_vmem else (48 << 20)
    default_blk = 512 if big_vmem else 256

    itemsize = jnp.dtype(compute_dtype).itemsize
    sub_mult = 16 if itemsize == 2 else 8       # bf16 packs 2 rows/sublane
    tn = _pick_tile(N, seq_block or default_blk, sub_mult)
    bq = _pick_tile(N, block_q or default_blk, sub_mult)
    bk = _pick_tile(N, block_k or default_blk, sub_mult)

    # ---- one-time parameter layout prep (do once at model load) -------------
    g = params["g"].reshape(1, D).astype(x.dtype)

    # (D, 3*H*Dh) columns ordered (qkv, h, d).  Fold the query scale into the
    # q columns, then reorder to (n_grp, D, hg*3*pack*Dh) so each grid step is
    # one wide matmul whose 128-lane output slabs are whole head-pair q/k/v.
    w = params["w_qkv"].reshape(D, 3, H, Dh)
    w = w * jnp.array([scale, 1.0, 1.0], w.dtype).reshape(1, 3, 1, 1)
    w = w.reshape(D, 3, HP, pack, Dh)
    bytes_per_pair = D * 3 * G * itemsize
    hg = max(1, min(HP, qkv_weight_budget // max(1, bytes_per_pair)))
    while HP % hg:
        hg -= 1
    n_grp = HP // hg
    w = w.reshape(D, 3, n_grp, hg, pack, Dh).transpose(2, 0, 3, 1, 4, 5)
    w = w.reshape(n_grp, D, hg * 3 * G).astype(compute_dtype)

    w_out = params["w_out"].astype(compute_dtype)                  # (H*Dh, D)

    # rotary: cos and sign-folded sin (rotate_half == roll), tiled per pair.
    has_rotary = rotary_emb is not None
    if has_rotary:
        pos = rotary_emb.astype(jnp.float32)
        cos = jnp.cos(pos)
        sin = jnp.sin(pos)
        sin_s = jnp.concatenate([-sin[:, : Dh // 2], sin[:, Dh // 2:]], axis=-1)
    else:
        cos = jnp.ones((N, Dh), jnp.float32)
        sin_s = jnp.zeros((N, Dh), jnp.float32)
    cos = jnp.tile(cos, (1, pack))
    sin_s = jnp.tile(sin_s, (1, pack))

    # ---- 1) fused RMSNorm + QKV + rotary ------------------------------------
    qkv_shape = jax.ShapeDtypeStruct((B, HP, N, G), compute_dtype)
    q, k, v = pl.pallas_call(
        functools.partial(_rmsnorm_qkv_rope_kernel, eps=eps, dh=Dh, pack=pack,
                          hg=hg, has_rotary=has_rotary),
        out_shape=(qkv_shape, qkv_shape, qkv_shape),
        grid=(B, n_grp, N // tn),
        in_specs=[
            pl.BlockSpec((1, tn, D), lambda b, gp, nb: (b, nb, 0)),
            pl.BlockSpec((1, D), lambda b, gp, nb: (0, 0)),
            pl.BlockSpec((1, D, hg * 3 * G), lambda b, gp, nb: (gp, 0, 0)),
            pl.BlockSpec((tn, G), lambda b, gp, nb: (nb, 0)),
            pl.BlockSpec((tn, G), lambda b, gp, nb: (nb, 0)),
        ],
        out_specs=(
            pl.BlockSpec((1, hg, tn, G), lambda b, gp, nb: (b, gp, nb, 0)),
            pl.BlockSpec((1, hg, tn, G), lambda b, gp, nb: (b, gp, nb, 0)),
            pl.BlockSpec((1, hg, tn, G), lambda b, gp, nb: (b, gp, nb, 0)),
        ),
        compiler_params=pltpu.CompilerParams(
            dimension_semantics=("parallel", "parallel", "parallel"),
            vmem_limit_bytes=vmem_limit),
    )(x, g, w, cos, sin_s)

    # ---- 2) flash attention over only the needed causal block pairs ---------
    num_q = N // bq
    qi_list, kv_list = [], []
    for qi in range(num_q):
        last = (qi * bq + bq - 1) // bk
        for kvb in range(last + 1):
            qi_list.append(qi)
            kv_list.append(kvb)
    qi_sched = jnp.asarray(qi_list, jnp.int32)
    kv_sched = jnp.asarray(kv_list, jnp.int32)
    n_steps = len(qi_list)

    attn = pl.pallas_call(
        functools.partial(_flash_attn_kernel, block_q=bq, block_k=bk,
                          dh=Dh, pack=pack),
        out_shape=jax.ShapeDtypeStruct((B, N, H * Dh), compute_dtype),
        grid_spec=pltpu.PrefetchScalarGridSpec(
            num_scalar_prefetch=2,
            grid=(B, HP, n_steps),
            in_specs=[
                pl.BlockSpec((1, 1, bq, G), lambda b, p, s, qs, ks: (b, p, qs[s], 0)),
                pl.BlockSpec((1, 1, bk, G), lambda b, p, s, qs, ks: (b, p, ks[s], 0)),
                pl.BlockSpec((1, 1, bk, G), lambda b, p, s, qs, ks: (b, p, ks[s], 0)),
            ],
            # output written straight into (B, N, H*Dh) -> 128-aligned columns
            out_specs=pl.BlockSpec((1, bq, G), lambda b, p, s, qs, ks: (b, qs[s], p)),
            scratch_shapes=[
                pltpu.VMEM((pack, bq, 1), jnp.float32),    # running row-max
                pltpu.VMEM((pack, bq, 1), jnp.float32),    # running denominator
                pltpu.VMEM((pack, bq, Dh), jnp.float32),   # output accumulator
            ]),
        compiler_params=pltpu.CompilerParams(
            dimension_semantics=("parallel", "parallel", "arbitrary"),
            vmem_limit_bytes=vmem_limit),
    )(qi_sched, kv_sched, q, k, v)

    # ---- 3) output projection: one full-depth matmul per (b, seq-tile) ------
    td = D if D <= 512 else _pick_tile(D, 512, 128)
    y = pl.pallas_call(
        _out_proj_kernel,
        out_shape=jax.ShapeDtypeStruct((B, N, D), x.dtype),
        grid=(B, N // tn, D // td),
        in_specs=[
            pl.BlockSpec((1, tn, H * Dh), lambda b, nb, dc: (b, nb, 0)),
            pl.BlockSpec((H * Dh, td), lambda b, nb, dc: (0, dc)),
        ],
        out_specs=pl.BlockSpec((1, tn, td), lambda b, nb, dc: (b, nb, dc)),
        compiler_params=pltpu.CompilerParams(
            dimension_semantics=("parallel", "parallel", "parallel"),
            vmem_limit_bytes=vmem_limit),
    )(attn, w_out)

    return y


# ---------------------------------------------------------------------------
# Pure-JAX reference (mirrors the PyTorch forward exactly)
# ---------------------------------------------------------------------------
def attention_reference(x, params, rotary_emb, *, heads, dim_head):
    with jax.default_matmul_precision("float32"):
        B, N, D = x.shape
        eps = jnp.finfo(x.dtype).eps
        xn = x * lax.rsqrt(jnp.mean(x * x, -1, keepdims=True) + eps) * params["g"]
        qkv = xn @ params["w_qkv"]
        qkv = qkv.reshape(B, N, 3, heads, dim_head).transpose(2, 0, 3, 1, 4)
        q, k, v = qkv[0], qkv[1], qkv[2]

        if rotary_emb is not None:
            def rot(t):
                d = t.shape[-1] // 2
                return jnp.concatenate([-t[..., d:], t[..., :d]], -1)
            cos, sin = jnp.cos(rotary_emb), jnp.sin(rotary_emb)
            q = q * cos + rot(q) * sin
            k = k * cos + rot(k) * sin

        q = q * dim_head ** -0.5
        sim = jnp.einsum("bhid,bhjd->bhij", q, k)
        mask = jnp.triu(jnp.ones((N, N), bool), 1)
        sim = jnp.where(mask, -jnp.finfo(sim.dtype).max, sim)
        attn = jax.nn.softmax(sim, -1)
        out = jnp.einsum("bhij,bhjd->bhid", attn, v)
        out = out.transpose(0, 2, 1, 3).reshape(B, N, heads * dim_head)
        return out @ params["w_out"]


# ---------------------------------------------------------------------------
if __name__ == "__main__":
    B, N, D = 2, 128, 128
    heads, dim_head = 8, 64
    dim_hidden = heads * dim_head

    key = jax.random.PRNGKey(0)
    kx, kq, ko = jax.random.split(key, 3)

    x = jax.random.normal(kx, (B, N, D), jnp.float32)
    params = {
        "g": jnp.ones((D,), jnp.float32),                                    # RMSNorm weight
        "w_qkv": jax.random.normal(kq, (D, 3 * dim_hidden), jnp.float32) * 0.02,
        "w_out": jax.random.normal(ko, (dim_hidden, D), jnp.float32) * 0.02,
    }

    # standard rotary embedding, shape (N, Dh)
    inv_freq = 1.0 / (10000.0 ** (jnp.arange(0, dim_head, 2, dtype=jnp.float32) / dim_head))
    t = jnp.arange(N, dtype=jnp.float32)
    freqs = t[:, None] * inv_freq[None, :]
    rotary_emb = jnp.concatenate([freqs, freqs], axis=-1)                    # (N, Dh)

    # Small tiles so the causal schedule, masked/unmasked branches and head-pair
    # packing are all exercised.
    fwd_bf16 = functools.partial(attention_forward, heads=heads, dim_head=dim_head,
                                 seq_block=64, block_q=64, block_k=64,
                                 compute_dtype=jnp.bfloat16)
    fwd_f32 = functools.partial(attention_forward, heads=heads, dim_head=dim_head,
                                seq_block=64, block_q=64, block_k=64,
                                compute_dtype=jnp.float32)

    y_ref = attention_reference(x, params, rotary_emb, heads=heads, dim_head=dim_head)

    # f32 compute path (numerics check)
    y32 = jax.block_until_ready(fwd_f32(x, params, rotary_emb))
    assert y32.shape == (B, N, D)
    assert jnp.allclose(y32, y_ref, rtol=2e-2, atol=2e-3), "f32 mismatch vs reference"

    # bf16 MXU path (production config; looser tolerance for bf16 rounding)
    y16 = jax.block_until_ready(fwd_bf16(x, params, rotary_emb))
    assert jnp.allclose(y16.astype(jnp.float32), y_ref, rtol=5e-2, atol=1e-2), \
        "bf16 mismatch vs reference"

    # no-rotary path
    y0 = jax.block_until_ready(fwd_f32(x, params, None))
    y0_ref = attention_reference(x, params, None, heads=heads, dim_head=dim_head)
    assert jnp.allclose(y0, y0_ref, rtol=2e-2, atol=2e-3), "no-rotary mismatch"

    print("KERNEL_OK")
</pallas_src>

<mosaic_0001>
module attributes {stable_mosaic.version = 11 : i64} {
  func.func @_rmsnorm_qkv_rope_kernel(%arg0: i32, %arg1: i32, %arg2: i32, %arg3: memref<1x64x128xf32, #tpu.memory_space<vmem>>, %arg4: memref<1x128xf32, #tpu.memory_space<vmem>>, %arg5: memref<1x128x1536xf32, #tpu.memory_space<vmem>>, %arg6: memref<64x128xf32, #tpu.memory_space<vmem>>, %arg7: memref<64x128xf32, #tpu.memory_space<vmem>>, %arg8: memref<1x4x64x128xf32, #tpu.memory_space<vmem>>, %arg9: memref<1x4x64x128xf32, #tpu.memory_space<vmem>>, %arg10: memref<1x4x64x128xf32, #tpu.memory_space<vmem>>) attributes {dimension_semantics = [#tpu.dimension_semantics<parallel>, #tpu.dimension_semantics<parallel>, #tpu.dimension_semantics<parallel>], iteration_bounds = array<i64: 2, 1, 2>, scalar_prefetch = 0 : i64, scratch_operands = 0 : i64, tpu.core_type = #tpu.core_type<tc>, window_params = [{transform_indices = @transform_0, window_bounds = array<i64: 1, 64, 128>}, {pipeline_mode = #tpu.pipeline_mode<synchronous>, transform_indices = @transform_1, window_bounds = array<i64: 1, 128>}, {transform_indices = @transform_2, window_bounds = array<i64: 1, 128, 1536>}, {transform_indices = @transform_3, window_bounds = array<i64: 64, 128>}, {transform_indices = @transform_4, window_bounds = array<i64: 64, 128>}, {transform_indices = @transform_5, window_bounds = array<i64: 1, 4, 64, 128>}, {transform_indices = @transform_6, window_bounds = array<i64: 1, 4, 64, 128>}, {transform_indices = @transform_7, window_bounds = array<i64: 1, 4, 64, 128>}]} {
    %c0 = arith.constant 0 : index
    %c0_0 = arith.constant 0 : index
    %c0_1 = arith.constant 0 : index
    %0 = vector.load %arg3[%c0, %c0_0, %c0_1] : memref<1x64x128xf32, #tpu.memory_space<vmem>>, vector<1x64x128xf32>
    %1 = vector.shape_cast %0 : vector<1x64x128xf32> to vector<64x128xf32>
    %2 = arith.mulf %1, %1 : vector<64x128xf32>
    %cst = arith.constant dense<0.000000e+00> : vector<64xf32>
    %3 = vector.multi_reduction <add>, %2, %cst [1] : vector<64x128xf32> to vector<64xf32>
    %4 = vector.shape_cast %3 : vector<64xf32> to vector<64x1xf32>
    %cst_2 = arith.constant 1.280000e+02 : f32
    %5 = vector.broadcast %cst_2 : f32 to vector<64x1xf32>
    %6 = arith.divf %4, %5 : vector<64x1xf32>
    %cst_3 = arith.constant 1.1920929E-7 : f32
    %7 = vector.broadcast %cst_3 : f32 to vector<64x1xf32>
    %8 = arith.addf %6, %7 : vector<64x1xf32>
    %9 = math.rsqrt %8 : vector<64x1xf32>
    %10 = vector.broadcast %9 : vector<64x1xf32> to vector<64x128xf32>
    %11 = arith.mulf %1, %10 : vector<64x128xf32>
    %c0_4 = arith.constant 0 : index
    %c0_5 = arith.constant 0 : index
    %12 = vector.load %arg4[%c0_4, %c0_5] : memref<1x128xf32, #tpu.memory_space<vmem>>, vector<1x128xf32>
    %13 = vector.broadcast %12 : vector<1x128xf32> to vector<64x128xf32>
    %14 = arith.mulf %11, %13 : vector<64x128xf32>
    %c0_6 = arith.constant 0 : index
    %c0_7 = arith.constant 0 : index
    %c0_8 = arith.constant 0 : index
    %15 = vector.load %arg5[%c0_6, %c0_7, %c0_8] : memref<1x128x1536xf32, #tpu.memory_space<vmem>>, vector<1x128x1536xf32>
    %16 = vector.shape_cast %15 : vector<1x128x1536xf32> to vector<128x1536xf32>
    %cst_9 = arith.constant dense<0.000000e+00> : vector<64x1536xf32>
    %17 = tpu.matmul %14, %16, %cst_9 {dimension_numbers = #tpu.dot_dimension_numbers<[1], [0], [0], [1], [0, 0, 1, 1], [], []>} : vector<64x128xf32>, vector<128x1536xf32>, vector<64x1536xf32> -> vector<64x1536xf32>
    %c0_10 = arith.constant 0 : index
    %c0_11 = arith.constant 0 : index
    %18 = vector.load %arg6[%c0_10, %c0_11] : memref<64x128xf32, #tpu.memory_space<vmem>>, vector<64x128xf32>
    %c0_12 = arith.constant 0 : index
    %c0_13 = arith.constant 0 : index
    %19 = vector.load %arg7[%c0_12, %c0_13] : memref<64x128xf32, #tpu.memory_space<vmem>>, vector<64x128xf32>
    %20 = tpu.iota {dimensions = array<i32: 1>} : vector<64x128xi32>
    %c32_i32 = arith.constant 32 : i32
    %21 = vector.broadcast %c32_i32 : i32 to vector<64x128xi32>
    %22 = arith.andi %20, %21 : vector<64x128xi32>
    %c0_i32 = arith.constant 0 : i32
    %23 = vector.broadcast %c0_i32 : i32 to vector<64x128xi32>
    %24 = arith.cmpi eq, %22, %23 : vector<64x128xi32>
    %25 = vector.extract_strided_slice %17 {offsets = [0, 0], sizes = [64, 128], strides = [1, 1]} : vector<64x1536xf32> to vector<64x128xf32>
    %26 = vector.extract_strided_slice %17 {offsets = [0, 128], sizes = [64, 128], strides = [1, 1]} : vector<64x1536xf32> to vector<64x128xf32>
    %27 = vector.extract_strided_slice %17 {offsets = [0, 256], sizes = [64, 128], strides = [1, 1]} : vector<64x1536xf32> to vector<64x128xf32>
    %28 = arith.mulf %25, %18 : vector<64x128xf32>
    %c32_i32_14 = arith.constant 32 : i32
    %29 = tpu.dynamic_rotate %25 by %c32_i32_14 dim 1 : vector<64x128xf32>, i32 -> vector<64x128xf32>
    %c96_i32 = arith.constant 96 : i32
    %30 = tpu.dynamic_rotate %25 by %c96_i32 dim 1 : vector<64x128xf32>, i32 -> vector<64x128xf32>
    %31 = arith.select %24, %30, %29 : vector<64x128xi1>, vector<64x128xf32>
    %32 = arith.mulf %31, %19 : vector<64x128xf32>
    %33 = arith.addf %28, %32 : vector<64x128xf32>
    %34 = arith.mulf %26, %18 : vector<64x128xf32>
    %c32_i32_15 = arith.constant 32 : i32
    %35 = tpu.dynamic_rotate %26 by %c32_i32_15 dim 1 : vector<64x128xf32>, i32 -> vector<64x128xf32>
    %c96_i32_16 = arith.constant 96 : i32
    %36 = tpu.dynamic_rotate %26 by %c96_i32_16 dim 1 : vector<64x128xf32>, i32 -> vector<64x128xf32>
    %37 = arith.select %24, %36, %35 : vector<64x128xi1>, vector<64x128xf32>
    %38 = arith.mulf %37, %19 : vector<64x128xf32>
    %39 = arith.addf %34, %38 : vector<64x128xf32>
    %c0_17 = arith.constant 0 : index
    %c0_18 = arith.constant 0 : index
    %c0_19 = arith.constant 0 : index
    %c0_20 = arith.constant 0 : index
    %40 = vector.load %arg8[%c0_17, %c0_18, %c0_19, %c0_20] : memref<1x4x64x128xf32, #tpu.memory_space<vmem>>, vector<1x1x64x128xf32>
    %41 = vector.shape_cast %40 : vector<1x1x64x128xf32> to vector<64x128xf32>
    %42 = vector.shape_cast %33 : vector<64x128xf32> to vector<1x1x64x128xf32>
    tpu.vector_store %arg8[%c0_17, %c0_18, %c0_19, %c0_20], %42 {strides = array<i32>} : memref<1x4x64x128xf32, #tpu.memory_space<vmem>>, vector<1x1x64x128xf32>,
    %c0_21 = arith.constant 0 : index
    %c0_22 = arith.constant 0 : index
    %c0_23 = arith.constant 0 : index
    %c0_24 = arith.constant 0 : index
    %43 = vector.load %arg9[%c0_21, %c0_22, %c0_23, %c0_24] : memref<1x4x64x128xf32, #tpu.memory_space<vmem>>, vector<1x1x64x128xf32>
    %44 = vector.shape_cast %43 : vector<1x1x64x128xf32> to vector<64x128xf32>
    %45 = vector.shape_cast %39 : vector<64x128xf32> to vector<1x1x64x128xf32>
    tpu.vector_store %arg9[%c0_21, %c0_22, %c0_23, %c0_24], %45 {strides = array<i32>} : memref<1x4x64x128xf32, #tpu.memory_space<vmem>>, vector<1x1x64x128xf32>,
    %c0_25 = arith.constant 0 : index
    %c0_26 = arith.constant 0 : index
    %c0_27 = arith.constant 0 : index
    %c0_28 = arith.constant 0 : index
    %46 = vector.load %arg10[%c0_25, %c0_26, %c0_27, %c0_28] : memref<1x4x64x128xf32, #tpu.memory_space<vmem>>, vector<1x1x64x128xf32>
    %47 = vector.shape_cast %46 : vector<1x1x64x128xf32> to vector<64x128xf32>
    %48 = vector.shape_cast %27 : vector<64x128xf32> to vector<1x1x64x128xf32>
    tpu.vector_store %arg10[%c0_25, %c0_26, %c0_27, %c0_28], %48 {strides = array<i32>} : memref<1x4x64x128xf32, #tpu.memory_space<vmem>>, vector<1x1x64x128xf32>,
    %49 = vector.extract_strided_slice %17 {offsets = [0, 384], sizes = [64, 128], strides = [1, 1]} : vector<64x1536xf32> to vector<64x128xf32>
    %50 = vector.extract_strided_slice %17 {offsets = [0, 512], sizes = [64, 128], strides = [1, 1]} : vector<64x1536xf32> to vector<64x128xf32>
    %51 = vector.extract_strided_slice %17 {offsets = [0, 640], sizes = [64, 128], strides = [1, 1]} : vector<64x1536xf32> to vector<64x128xf32>
    %52 = arith.mulf %49, %18 : vector<64x128xf32>
    %c32_i32_29 = arith.constant 32 : i32
    %53 = tpu.dynamic_rotate %49 by %c32_i32_29 dim 1 : vector<64x128xf32>, i32 -> vector<64x128xf32>
    %c96_i32_30 = arith.constant 96 : i32
    %54 = tpu.dynamic_rotate %49 by %c96_i32_30 dim 1 : vector<64x128xf32>, i32 -> vector<64x128xf32>
    %55 = arith.select %24, %54, %53 : vector<64x128xi1>, vector<64x128xf32>
    %56 = arith.mulf %55, %19 : vector<64x128xf32>
    %57 = arith.addf %52, %56 : vector<64x128xf32>
    %58 = arith.mulf %50, %18 : vector<64x128xf32>
    %c32_i32_31 = arith.constant 32 : i32
    %59 = tpu.dynamic_rotate %50 by %c32_i32_31 dim 1 : vector<64x128xf32>, i32 -> vector<64x128xf32>
    %c96_i32_32 = arith.constant 96 : i32
    %60 = tpu.dynamic_rotate %50 by %c96_i32_32 dim 1 : vector<64x128xf32>, i32 -> vector<64x128xf32>
    %61 = arith.select %24, %60, %59 : vector<64x128xi1>, vector<64x128xf32>
    %62 = arith.mulf %61, %19 : vector<64x128xf32>
    %63 = arith.addf %58, %62 : vector<64x128xf32>
    %c0_33 = arith.constant 0 : index
    %c1 = arith.constant 1 : index
    %c0_34 = arith.constant 0 : index
    %c0_35 = arith.constant 0 : index
    %64 = vector.load %arg8[%c0_33, %c1, %c0_34, %c0_35] : memref<1x4x64x128xf32, #tpu.memory_space<vmem>>, vector<1x1x64x128xf32>
    %65 = vector.shape_cast %64 : vector<1x1x64x128xf32> to vector<64x128xf32>
    %66 = vector.shape_cast %57 : vector<64x128xf32> to vector<1x1x64x128xf32>
    tpu.vector_store %arg8[%c0_33, %c1, %c0_34, %c0_35], %66 {strides = array<i32>} : memref<1x4x64x128xf32, #tpu.memory_space<vmem>>, vector<1x1x64x128xf32>,
    %c0_36 = arith.constant 0 : index
    %c1_37 = arith.constant 1 : index
    %c0_38 = arith.constant 0 : index
    %c0_39 = arith.constant 0 : index
    %67 = vector.load %arg9[%c0_36, %c1_37, %c0_38, %c0_39] : memref<1x4x64x128xf32, #tpu.memory_space<vmem>>, vector<1x1x64x128xf32>
    %68 = vector.shape_cast %67 : vector<1x1x64x128xf32> to vector<64x128xf32>
    %69 = vector.shape_cast %63 : vector<64x128xf32> to vector<1x1x64x128xf32>
    tpu.vector_store %arg9[%c0_36, %c1_37, %c0_38, %c0_39], %69 {strides = array<i32>} : memref<1x4x64x128xf32, #tpu.memory_space<vmem>>, vector<1x1x64x128xf32>,
    %c0_40 = arith.constant 0 : index
    %c1_41 = arith.constant 1 : index
    %c0_42 = arith.constant 0 : index
    %c0_43 = arith.constant 0 : index
    %70 = vector.load %arg10[%c0_40, %c1_41, %c0_42, %c0_43] : memref<1x4x64x128xf32, #tpu.memory_space<vmem>>, vector<1x1x64x128xf32>
    %71 = vector.shape_cast %70 : vector<1x1x64x128xf32> to vector<64x128xf32>
    %72 = vector.shape_cast %51 : vector<64x128xf32> to vector<1x1x64x128xf32>
    tpu.vector_store %arg10[%c0_40, %c1_41, %c0_42, %c0_43], %72 {strides = array<i32>} : memref<1x4x64x128xf32, #tpu.memory_space<vmem>>, vector<1x1x64x128xf32>,
    %73 = vector.extract_strided_slice %17 {offsets = [0, 768], sizes = [64, 128], strides = [1, 1]} : vector<64x1536xf32> to vector<64x128xf32>
    %74 = vector.extract_strided_slice %17 {offsets = [0, 896], sizes = [64, 128], strides = [1, 1]} : vector<64x1536xf32> to vector<64x128xf32>
    %75 = vector.extract_strided_slice %17 {offsets = [0, 1024], sizes = [64, 128], strides = [1, 1]} : vector<64x1536xf32> to vector<64x128xf32>
    %76 = arith.mulf %73, %18 : vector<64x128xf32>
    %c32_i32_44 = arith.constant 32 : i32
    %77 = tpu.dynamic_rotate %73 by %c32_i32_44 dim 1 : vector<64x128xf32>, i32 -> vector<64x128xf32>
    %c96_i32_45 = arith.constant 96 : i32
    %78 = tpu.dynamic_rotate %73 by %c96_i32_45 dim 1 : vector<64x128xf32>, i32 -> vector<64x128xf32>
    %79 = arith.select %24, %78, %77 : vector<64x128xi1>, vector<64x128xf32>
    %80 = arith.mulf %79, %19 : vector<64x128xf32>
    %81 = arith.addf %76, %80 : vector<64x128xf32>
    %82 = arith.mulf %74, %18 : vector<64x128xf32>
    %c32_i32_46 = arith.constant 32 : i32
    %83 = tpu.dynamic_rotate %74 by %c32_i32_46 dim 1 : vector<64x128xf32>, i32 -> vector<64x128xf32>
    %c96_i32_47 = arith.constant 96 : i32
    %84 = tpu.dynamic_rotate %74 by %c96_i32_47 dim 1 : vector<64x128xf32>, i32 -> vector<64x128xf32>
    %85 = arith.select %24, %84, %83 : vector<64x128xi1>, vector<64x128xf32>
    %86 = arith.mulf %85, %19 : vector<64x128xf32>
    %87 = arith.addf %82, %86 : vector<64x128xf32>
    %c0_48 = arith.constant 0 : index
    %c2 = arith.constant 2 : index
    %c0_49 = arith.constant 0 : index
    %c0_50 = arith.constant 0 : index
    %88 = vector.load %arg8[%c0_48, %c2, %c0_49, %c0_50] : memref<1x4x64x128xf32, #tpu.memory_space<vmem>>, vector<1x1x64x128xf32>
    %89 = vector.shape_cast %88 : vector<1x1x64x128xf32> to vector<64x128xf32>
    %90 = vector.shape_cast %81 : vector<64x128xf32> to vector<1x1x64x128xf32>
    tpu.vector_store %arg8[%c0_48, %c2, %c0_49, %c0_50], %90 {strides = array<i32>} : memref<1x4x64x128xf32, #tpu.memory_space<vmem>>, vector<1x1x64x128xf32>,
    %c0_51 = arith.constant 0 : index
    %c2_52 = arith.constant 2 : index
    %c0_53 = arith.constant 0 : index
    %c0_54 = arith.constant 0 : index
    %91 = vector.load %arg9[%c0_51, %c2_52, %c0_53, %c0_54] : memref<1x4x64x128xf32, #tpu.memory_space<vmem>>, vector<1x1x64x128xf32>
    %92 = vector.shape_cast %91 : vector<1x1x64x128xf32> to vector<64x128xf32>
    %93 = vector.shape_cast %87 : vector<64x128xf32> to vector<1x1x64x128xf32>
    tpu.vector_store %arg9[%c0_51, %c2_52, %c0_53, %c0_54], %93 {strides = array<i32>} : memref<1x4x64x128xf32, #tpu.memory_space<vmem>>, vector<1x1x64x128xf32>,
    %c0_55 = arith.constant 0 : index
    %c2_56 = arith.constant 2 : index
    %c0_57 = arith.constant 0 : index
    %c0_58 = arith.constant 0 : index
    %94 = vector.load %arg10[%c0_55, %c2_56, %c0_57, %c0_58] : memref<1x4x64x128xf32, #tpu.memory_space<vmem>>, vector<1x1x64x128xf32>
    %95 = vector.shape_cast %94 : vector<1x1x64x128xf32> to vector<64x128xf32>
    %96 = vector.shape_cast %75 : vector<64x128xf32> to vector<1x1x64x128xf32>
    tpu.vector_store %arg10[%c0_55, %c2_56, %c0_57, %c0_58], %96 {strides = array<i32>} : memref<1x4x64x128xf32, #tpu.memory_space<vmem>>, vector<1x1x64x128xf32>,
    %97 = vector.extract_strided_slice %17 {offsets = [0, 1152], sizes = [64, 128], strides = [1, 1]} : vector<64x1536xf32> to vector<64x128xf32>
    %98 = vector.extract_strided_slice %17 {offsets = [0, 1280], sizes = [64, 128], strides = [1, 1]} : vector<64x1536xf32> to vector<64x128xf32>
    %99 = vector.extract_strided_slice %17 {offsets = [0, 1408], sizes = [64, 128], strides = [1, 1]} : vector<64x1536xf32> to vector<64x128xf32>
    %100 = arith.mulf %97, %18 : vector<64x128xf32>
    %c32_i32_59 = arith.constant 32 : i32
    %101 = tpu.dynamic_rotate %97 by %c32_i32_59 dim 1 : vector<64x128xf32>, i32 -> vector<64x128xf32>
    %c96_i32_60 = arith.constant 96 : i32
    %102 = tpu.dynamic_rotate %97 by %c96_i32_60 dim 1 : vector<64x128xf32>, i32 -> vector<64x128xf32>
    %103 = arith.select %24, %102, %101 : vector<64x128xi1>, vector<64x128xf32>
    %104 = arith.mulf %103, %19 : vector<64x128xf32>
    %105 = arith.addf %100, %104 : vector<64x128xf32>
    %106 = arith.mulf %98, %18 : vector<64x128xf32>
    %c32_i32_61 = arith.constant 32 : i32
    %107 = tpu.dynamic_rotate %98 by %c32_i32_61 dim 1 : vector<64x128xf32>, i32 -> vector<64x128xf32>
    %c96_i32_62 = arith.constant 96 : i32
    %108 = tpu.dynamic_rotate %98 by %c96_i32_62 dim 1 : vector<64x128xf32>, i32 -> vector<64x128xf32>
    %109 = arith.select %24, %108, %107 : vector<64x128xi1>, vector<64x128xf32>
    %110 = arith.mulf %109, %19 : vector<64x128xf32>
    %111 = arith.addf %106, %110 : vector<64x128xf32>
    %c0_63 = arith.constant 0 : index
    %c3 = arith.constant 3 : index
    %c0_64 = arith.constant 0 : index
    %c0_65 = arith.constant 0 : index
    %112 = vector.load %arg8[%c0_63, %c3, %c0_64, %c0_65] : memref<1x4x64x128xf32, #tpu.memory_space<vmem>>, vector<1x1x64x128xf32>
    %113 = vector.shape_cast %112 : vector<1x1x64x128xf32> to vector<64x128xf32>
    %114 = vector.shape_cast %105 : vector<64x128xf32> to vector<1x1x64x128xf32>
    tpu.vector_store %arg8[%c0_63, %c3, %c0_64, %c0_65], %114 {strides = array<i32>} : memref<1x4x64x128xf32, #tpu.memory_space<vmem>>, vector<1x1x64x128xf32>,
    %c0_66 = arith.constant 0 : index
    %c3_67 = arith.constant 3 : index
    %c0_68 = arith.constant 0 : index
    %c0_69 = arith.constant 0 : index
    %115 = vector.load %arg9[%c0_66, %c3_67, %c0_68, %c0_69] : memref<1x4x64x128xf32, #tpu.memory_space<vmem>>, vector<1x1x64x128xf32>
    %116 = vector.shape_cast %115 : vector<1x1x64x128xf32> to vector<64x128xf32>
    %117 = vector.shape_cast %111 : vector<64x128xf32> to vector<1x1x64x128xf32>
    tpu.vector_store %arg9[%c0_66, %c3_67, %c0_68, %c0_69], %117 {strides = array<i32>} : memref<1x4x64x128xf32, #tpu.memory_space<vmem>>, vector<1x1x64x128xf32>,
    %c0_70 = arith.constant 0 : index
    %c3_71 = arith.constant 3 : index
    %c0_72 = arith.constant 0 : index
    %c0_73 = arith.constant 0 : index
    %118 = vector.load %arg10[%c0_70, %c3_71, %c0_72, %c0_73] : memref<1x4x64x128xf32, #tpu.memory_space<vmem>>, vector<1x1x64x128xf32>
    %119 = vector.shape_cast %118 : vector<1x1x64x128xf32> to vector<64x128xf32>
    %120 = vector.shape_cast %99 : vector<64x128xf32> to vector<1x1x64x128xf32>
    tpu.vector_store %arg10[%c0_70, %c3_71, %c0_72, %c0_73], %120 {strides = array<i32>} : memref<1x4x64x128xf32, #tpu.memory_space<vmem>>, vector<1x1x64x128xf32>,
    return
  }
  func.func @transform_0(%arg0: i32, %arg1: i32, %arg2: i32) -> (i32, i32, i32) {
    %c0_i32 = arith.constant 0 : i32
    %c0_i32_0 = arith.constant 0 : i32
    return %arg0, %arg2, %c0_i32 : i32, i32, i32
  }
  func.func @transform_1(%arg0: i32, %arg1: i32, %arg2: i32) -> (i32, i32) {
    %c0_i32 = arith.constant 0 : i32
    %c0_i32_0 = arith.constant 0 : i32
    %c0_i32_1 = arith.constant 0 : i32
    return %c0_i32, %c0_i32_0 : i32, i32
  }
  func.func @transform_2(%arg0: i32, %arg1: i32, %arg2: i32) -> (i32, i32, i32) {
    %c0_i32 = arith.constant 0 : i32
    %c0_i32_0 = arith.constant 0 : i32
    %c0_i32_1 = arith.constant 0 : i32
    return %arg1, %c0_i32, %c0_i32_0 : i32, i32, i32
  }
  func.func @transform_3(%arg0: i32, %arg1: i32, %arg2: i32) -> (i32, i32) {
    %c0_i32 = arith.constant 0 : i32
    %c0_i32_0 = arith.constant 0 : i32
    return %arg2, %c0_i32 : i32, i32
  }
  func.func @transform_4(%arg0: i32, %arg1: i32, %arg2: i32) -> (i32, i32) {
    %c0_i32 = arith.constant 0 : i32
    %c0_i32_0 = arith.constant 0 : i32
    return %arg2, %c0_i32 : i32, i32
  }
  func.func @transform_5(%arg0: i32, %arg1: i32, %arg2: i32) -> (i32, i32, i32, i32) {
    %c0_i32 = arith.constant 0 : i32
    %c0_i32_0 = arith.constant 0 : i32
    return %arg0, %arg1, %arg2, %c0_i32 : i32, i32, i32, i32
  }
  func.func @transform_6(%arg0: i32, %arg1: i32, %arg2: i32) -> (i32, i32, i32, i32) {
    %c0_i32 = arith.constant 0 : i32
    %c0_i32_0 = arith.constant 0 : i32
    return %arg0, %arg1, %arg2, %c0_i32 : i32, i32, i32, i32
  }
  func.func @transform_7(%arg0: i32, %arg1: i32, %arg2: i32) -> (i32, i32, i32, i32) {
    %c0_i32 = arith.constant 0 : i32
    %c0_i32_0 = arith.constant 0 : i32
    return %arg0, %arg1, %arg2, %c0_i32 : i32, i32, i32, i32
  }
}

</mosaic_0001>

<bundles_post_ra>
// kernel: tpu_custom_call.1
= control target key start
LH: loop header
LB: loop body
LE: loop exit
PB: predicated region body
PF: predicated region fallthrough
CT: control target
= control target key end

     0   :  { %s4691_s0 = inlined_call_operand.hbm [shape: f32[2,128,128], index: 0, kind: input, shape index: {}]   ;;  %s4692_s1 = inlined_call_operand.vmem [shape: f32[1,128], index: 1, kind: input, shape index: {}]   ;;  %s4693_s2 = inlined_call_operand.hbm [shape: f32[1,128,1536], index: 2, kind: input, shape index: {}]   ;;  %s4694_s3 = inlined_call_operand.hbm [shape: f32[128,128], index: 3, kind: input, shape index: {}]   ;;  %s4695_s4 = inlined_call_operand.hbm [shape: f32[128,128], index: 4, kind: input, shape index: {}]   ;;  %s4696_s5 = inlined_call_operand.hbm [shape: f32[2,4,128,128], index: 5, kind: output, shape index: {0}]   ;;  %s4697_s6 = inlined_call_operand.hbm [shape: f32[2,4,128,128], index: 6, kind: output, shape index: {1}]   ;;  %s4698_s7 = inlined_call_operand.hbm [shape: f32[2,4,128,128], index: 7, kind: output, shape index: {2}]  }
   0x1   :  { %4732 = sst [smem:[#allocation45_spill]] %s4691_s0 }
   0x2   :  { %4733 = sst [smem:[#allocation46_spill]] %s4692_s1 }
   0x3   :  { %4734 = sst [smem:[#allocation47_spill]] %s4693_s2 }
   0x4   :  { %4735 = sst [smem:[#allocation48_spill]] %s4694_s3 }
   0x5   :  { %4736 = sst [smem:[#allocation49_spill]] %s4696_s5 }
   0x6   :  { %4737 = sst [smem:[#allocation50_spill]] %s4697_s6 }
   0x7   :  { %4738 = sst [smem:[#allocation51_spill]] %s4698_s7 }
   0x8   :  { %13 = vsyncpa [#allocation3], 0 }
   0x9   :  { %15 = vsyncpa [#allocation3 + $0x1], 0 }
   0xa   :  { %16 = vsyncpa [#allocation6], 0 }
   0xb   :  { %17 = vsyncpa [#allocation4], 0 }
   0xc   :  { %19 = vsyncpa [#allocation4 + $0x1], 0 }
   0xd   :  { %20 = vsyncpa [#allocation11], 0 }
   0xe   :  { %22 = vsyncpa [#allocation11 + $0x1], 0  ;;  %s3210_s24 = smov 0   ;;  %s3212_s25 = smov 0  }
   0xf   :  { %s3214_s26 = smov 0   ;;  %s3216_s27 = smov 0  }
  0x10   :  { %s3218_s28 = smov 0   ;;  %s3220_s29 = smov 0  }
  0x11   :  { %s3222_s30 = smov 0   ;;  %s3224_s8 = smov 0  }
  0x12   :  { %s3226_s9 = smov 0   ;;  %s3228_s10 = smov 0  }
  0x13   :  { %s3230_s11 = smov 0  }
  0x14 LB: > { %4739 = sst [smem:[#allocation24_spill]] %s3119_s29  ;;  %s40_s12 = sadd.s32 1, %s3131_s9  ;;  %s3139_s11 = sphi %s3230_s11, %s28_s11   ;;  %s3135_s10 = sphi %s3228_s10, %s4814_s10   ;;  %s3131_s9 = sphi %s3226_s9, %s4821_s9   ;;  %s3127_s8 = sphi %s3224_s8, %s4812_s8   ;;  %s3123_s30 = sphi %s3222_s30, %s4820_s30   ;;  %s3119_s29 = sphi %s3220_s29, %s4811_s29   ;;  %s3115_s28 = sphi %s3218_s28, %s4819_s28   ;;  %s3111_s27 = sphi %s3216_s27, %s4818_s27   ;;  %s3107_s26 = sphi %s3214_s26, %s4817_s26   ;;  %s3103_s25 = sphi %s3212_s25, %s4816_s25   ;;  %s3099_s24 = sphi %s3210_s24, %s4815_s24  }
  0x15   : > { %4740 = sst [smem:[#allocation25_spill]] %s3123_s30  ;;  %s47_s13 = sadd.s32 1, %s3135_s10 }
  0x16   : > { %4741 = sst [smem:[#allocation26_spill]] %s3127_s8  ;;  %p41_p0 = scmp.ge.s32.totalorder %s40_s12, 2 }
  0x17   : > { %4742 = sst [smem:[#allocation27_spill]] %s3135_s10  ;;  %s56_s14 = sadd.s32 1, %s3119_s29 }
  0x18   : > { %p4701_p1 = scmp.ne.s32.totalorder %s3119_s29, %s3115_s28  ;;  %p4703_p2 = scmp.eq.s32.totalorder %s3139_s11, 0 }
  0x19   : > { %s4823_s12 = smov (%p41_p0, %s40_s12), 0  ;;  %s4825_s13 = smov (!%p41_p0, %s47_s13), %s3135_s10 }
  0x1a   : > { %4743 = sst [smem:[#allocation28_spill]] %s4823_s12  ;;  %s3276_s15 = ssub.s32 %s3131_s9, %s4823_s12 }
  0x1b   : > { %p3283_p3 = por %p4703_p2, %p4701_p1  ;;  %p49_p4 = scmp.ge.s32.totalorder %s4825_s13, 2 }
  0x1c   : > { %p127_p5 = scmp.eq.s32.totalorder %s3276_s15, 0  ;;  %p4702_p6 = scmp.lt.s32.totalorder %s3139_s11, 4 }
  0x1d   : > { %s4827_s13 = smov (%p49_p4, %s4825_s13), 0  ;;  %s301_s17 = sand.u32 1, %s3139_s11  }
  0x1e   : > { %4745 = sst [smem:[#allocation29_spill]] %s4827_s13  ;;  %s303_s18 = sand.u32 1, %s3119_s29  }
  0x1f   : > { %s51_s19 = ssub.s32 %s3135_s10, %s4827_s13  ;;  %s2424_s21 = sshll.u32 %s303_s18, 6 }
  0x20   : > { %s53_s20 = sor.u32 %s3276_s15, %s51_s19  ;;  %s2425_s22 = sshll.u32 %s3131_s9, 3 }
  0x21   : > { %p54_p7 = scmp.eq.s32.totalorder %s53_s20, 0  ;;  %s2426_s23 = sshll.u32 %s3135_s10, 4 }
  0x22   : > { %s311_s7 = sadd.s32 %s2426_s23, %s2425_s22  ;;  %s305_s6 = scalar_lea.vmem [#allocation2], %s2424_s21 }
  0x23   : > { %s3299_s12 = scalar_select %p54_p7, %s3119_s29, %s56_s14  }
  0x24   : > { %s314_s5 = sshll.u32 %s305_s6, 4  ;;  %s2427_s8 = sshll.u32 %s311_s7, 7  ;;  %s3301_s5 = int_to_ptr.vmem [resolvable:$true] %s314_s5 }
  0x25   : > { %4746 = sst [smem:[#allocation30_spill]] %s3299_s12  ;;  %s4747_s0 = sld [smem:[#allocation45_spill]] }
  0x26   : > { %p3312_p8 = pnand %p4702_p6, %p3283_p3  ;;  %s3316_s6 = scalar_lea.sflag [#allocation3], %s301_s17 }
  0x28   : > { %p2917_p10 = pneg %p3312_p8 }
  0x2b   : > { %s3306_s2 = scalar_lea.hbm %s4747_s0, %s2427_s8  ;;  %s2920_s8 = scalar_lea.hbm %s4747_s0, 4096 }
  0x2c   : > { %s2915_s7 = scalar_lea.hbm %s3306_s2, 1024  ;;  %p2921_p13 = scmp.lt.u32.totalorder %s3306_s2, %s4747_s0 }
  0x2d   : > { %p2916_p9 = scmp.ne.s32.totalorder %s3306_s2, %s2915_s7  ;;  %p2922_p0 = scmp.lt.u32.totalorder %s2920_s8, %s2915_s7 }
  0x2e   : > { %p2924_p4 = scmp.lt.u32.totalorder %s2915_s7, %s3306_s2 }
  0x2f   : > { %p2918_p11 = pnand %p2917_p10, %p2916_p9  ;;  %p2923_p3 = por %p2922_p0, %p2921_p13 }
  0x31   : > { %p2919_p12 = pneg %p2918_p11  ;;  %p2925_p7 = por %p2924_p4, %p2923_p3 }
  0x33   : > { %p2926_p1 = pnand %p2925_p7, %p2919_p12 }
  0x35   : > { %2929 = shalt.err (!%p2926_p1)
}
  0x36   : > { %s2930_s17 = scalar_lea.vmem %s3301_s5, 1024  ;;  %s3141_s19 = smov [#allocation2]  }
  0x37   : > { %p2931_p9 = scmp.ne.s32.totalorder %s3301_s5, %s2930_s17  ;;  %s2935_s20 = sshll.u32 %s3141_s19, 4  ;;  %s2936_s20 = int_to_ptr.vmem [resolvable:$false] %s2935_s20 }
  0x38   : > { %s2937_s21 = scalar_lea.vmem %s2936_s20, 2048  ;;  %p2938_p2 = scmp.lt.s32.totalorder %s3301_s5, %s2936_s20 }
  0x39   : > { %p2933_p11 = pnand %p2931_p9, %p2917_p10  ;;  %p2939_p13 = scmp.lt.s32.totalorder %s2937_s21, %s2930_s17 }
  0x3b   : > { %p2934_p6 = pneg %p2933_p11  ;;  %p2940_p0 = por %p2939_p13, %p2938_p2 }
  0x3d   : > { %p2941_p3 = pnand %p2940_p0, %p2934_p6 }
  0x3f   : > { %2944 = shalt.err (!%p2941_p3)
}
  0x40   : > { %s4706_s22 = smov 128   ;;  %s4707_s23 = smov 8  }
  0x41   : > { %2764 = dma.hbm_to_vmem [thread:$0]  (!%p3312_p8), %s3306_s2, 1024, %s3301_s5, %s3316_s6, %s4706_s22, %s4706_s22, %s4707_s23  }
  0x42   : > { %s2529_s7 = sshll.u32 %s3131_s9, 10  ;;  %s129_s1 = sadd.s32 1, %s3107_s26 }
  0x43   : > { %p136_p1 = scmp.ne.s32.totalorder %s3107_s26, %s3103_s25  ;;  %p4749_p2 = scmp.eq.s32.totalorder %s3139_s11, 0 }
  0x44   : > { %s3354_s30 = scalar_select %p127_p5, %s3107_s26, %s129_s1  }
  0x45   : > { %p138_p6 = por %p136_p1, %p4749_p2  ;;  %s326_s8 = sand.u32 1, %s3107_s26  }
  0x46   : > { %s3359_s16 = sshll.u32 %s326_s8, 6  ;;  %s4750_s3 = sld [smem:[#allocation48_spill]] }
  0x47   : > { %p4751_p10 = scmp.lt.s32.totalorder %s3139_s11, 4  ;;  %s328_s5 = scalar_lea.vmem [#allocation7], %s3359_s16 }
  0x48   : > { %s335_s15 = sshll.u32 %s328_s5, 4  ;;  %s3375_s15 = int_to_ptr.vmem [resolvable:$true] %s335_s15 }
  0x49   : > { %p3370_p8 = pnand %p4751_p10, %p138_p6 }
  0x4b   : > { %s4752_s2 = scalar_select %p3370_p8, 1, 0 }
  0x4c   : > { %s3366_s14 = scalar_lea.hbm %s4750_s3, %s2529_s7  ;;  %p4704_p12 = pneg %p3370_p8 }
  0x4d   : > { %s2945_s19 = scalar_lea.hbm %s3366_s14, 1024  ;;  %s2950_s1 = scalar_lea.hbm %s4750_s3, 2048 }
  0x4e   : > { %p2946_p5 = scmp.ne.s32.totalorder %s3366_s14, %s2945_s19  ;;  %p2951_p9 = scmp.lt.u32.totalorder %s3366_s14, %s4750_s3 }
  0x4f   : > { %p2952_p11 = scmp.lt.u32.totalorder %s2950_s1, %s2945_s19  ;;  %p2954_p0 = scmp.lt.u32.totalorder %s2945_s19, %s3366_s14 }
  0x50   : > { %p2948_p4 = pnand %p4704_p12, %p2946_p5 }
  0x51   : > { %p2953_p13 = por %p2952_p11, %p2951_p9 }
  0x52   : > { %p2949_p7 = pneg %p2948_p4 }
  0x53   : > { %p2955_p3 = por %p2954_p0, %p2953_p13 }
  0x55   : > { %p2956_p1 = pnand %p2955_p3, %p2949_p7 }
  0x57   : > { %2959 = shalt.err (!%p2956_p1)
}
  0x58   : > { %s2960_s17 = scalar_lea.vmem %s3375_s15, 1024  ;;  %s3144_s5 = smov [#allocation7]  }
  0x59   : > { %p2961_p2 = scmp.ne.s32.totalorder %s3375_s15, %s2960_s17  ;;  %s2965_s20 = sshll.u32 %s3144_s5, 4  ;;  %s2966_s20 = int_to_ptr.vmem [resolvable:$false] %s2965_s20 }
  0x5a   : > { %s2967_s21 = scalar_lea.vmem %s2966_s20, 2048  ;;  %p2968_p5 = scmp.lt.s32.totalorder %s3375_s15, %s2966_s20 }
  0x5b   : > { %p2963_p6 = pnand %p2961_p2, %p4704_p12  ;;  %p2969_p4 = scmp.lt.s32.totalorder %s2967_s21, %s2960_s17 }
  0x5d   : > { %p2964_p10 = pneg %p2963_p6  ;;  %p2970_p9 = por %p2969_p4, %p2968_p5 }
  0x5f   : > { %p2971_p11 = pnand %p2970_p9, %p2964_p10 }
  0x61   : > { %2974 = shalt.err (!%p2971_p11)
}
  0x62   : > { %2767 = dma.hbm_to_vmem [thread:$0]  (!%p3370_p8), %s3366_s14, 1024, %s3375_s15, %s3316_s6, %s4706_s22, %s4706_s22, %s4707_s23  }
  0x63   : > { %s3407_s19 = sadd.s32 4294967295, %s3139_s11   ;;  %s4705_s1 = sadd.s32 4294967294, %s3139_s11  }
  0x64   : > { %p69_p7 = scmp.ne.s32.totalorder %s3115_s28, %s3111_s27  ;;  %p4711_p13 = scmp.eq.s32.totalorder %s3407_s19, 0 }
  0x65   : > { %p142_p0 = scmp.ne.s32.totalorder %s3103_s25, %s3099_s24  ;;  %p196_p3 = scmp.eq.s32.totalorder %s3407_s19, 3 }
  0x66   : > { %p202_p1 = scmp.eq.s32.totalorder %s4705_s1, 3  ;;  %p3420_p2 = por %p4711_p13, %p69_p7 }
  0x67   : > { %p3426_p6 = por %p142_p0, %p4711_p13  ;;  %p4755_p10 = scmp.ne.s32.totalorder %s3119_s29, %s3115_s28 }
  0x68   : > { %s4753_s8 = scalar_select %p3420_p2, 1, 0 }
  0x69   : > { %s4754_s14 = scalar_select %p3426_p6, 1, 0 }
  0x6a   : > { %p3433_p5 = por %p196_p3, %p4755_p10  ;;  %p3437_p4 = por %p202_p1, %p69_p7 }
  0x6b   : > { %p2421_p9 = scmp.ge.s32.totalorder %s3139_s11, 1  ;;  %p269_p11 = scmp.lt.s32.totalorder %s3139_s11, 5 }
  0x6c   : > { %s4756_s15 = scalar_select %p3433_p5, 1, 0 }
  0x6d   : > { %s4757_s24 = scalar_select %p3437_p4, 1, 0 }
  0x6e   : > { %p3443_p12 = pnand %p2421_p9, %p269_p11  ;;  %s3145_s17 = smov [#allocation5]  }
  0x6f   : > { %s287_s5 = sshll.u32 %s3145_s17, 4  ;;  %s349_s21 = scalar_lea.vmem [#allocation8], %s3359_s16  ;;  %s3447_s5 = int_to_ptr.vmem [resolvable:$true] %s287_s5 }
  0x70   : > { %s4758_s18 = scalar_select %p3443_p12, 1, 0 }
  0x71   : > { %p2757_p0 = pneg %p3443_p12  ;;  %s356_s1 = sshll.u32 %s349_s21, 4  ;;  %s3465_s1 = int_to_ptr.vmem [resolvable:$true] %s356_s1 }
  0x72   : > { %s3463_s0 = scalar_lea.hbm %s4695_s4, %s2529_s7  ;;  %s4760_s13 = sld [smem:[#allocation47_spill]] }
  0x73   : > { %p3453_p3 = pnand %p2757_p0, %p4711_p13 }
  0x75   : > { %p2977_p1 = pneg %p3453_p3 }
  0x78   : > { %s2975_s10 = scalar_lea.hbm %s4760_s13, 24576 }
  0x79   : > { %p2976_p7 = scmp.ne.s32.totalorder %s4760_s13, %s2975_s10  ;;  %p2982_p11 = scmp.lt.u32.totalorder %s2975_s10, %s4760_s13 }
  0x7b   : > { %p2978_p10 = pnand %p2977_p1, %p2976_p7 }
  0x7d   : > { %p2979_p9 = pneg %p2978_p10 }
  0x7f   : > { %p2984_p0 = pnand %p2982_p11, %p2979_p9 }
  0x81   : > { %2987 = shalt.err (!%p2984_p0)
}
  0x82   : > { %s2988_s22 = scalar_lea.vmem %s3447_s5, 24576  ;;  %p2996_p6 = scmp.lt.s32.totalorder %s3447_s5, %s3447_s5 }
  0x83   : > { %p2989_p13 = scmp.ne.s32.totalorder %s3447_s5, %s2988_s22  ;;  %p2997_p2 = scmp.lt.s32.totalorder %s2988_s22, %s2988_s22 }
  0x85   : > { %p2991_p4 = pnand %p2989_p13, %p2977_p1  ;;  %p2998_p12 = por %p2997_p2, %p2996_p6 }
  0x87   : > { %p2992_p5 = pneg %p2991_p4 }
  0x89   : > { %p2999_p8 = pnand %p2998_p12, %p2992_p5 }
  0x8b   : > { %3002 = shalt.err (!%p2999_p8)
}
  0x8c   : > { %s3146_s3 = smov 1536   ;;  %s3147_s29 = smov 96  }
  0x8d   : > { %2760 = dma.hbm_to_vmem [thread:$0]  (!%p3453_p3), %s4760_s13, 24576, %s3447_s5, [#allocation6], %s3146_s3, %s3146_s3, %s3147_s29  }
  0x8e   : > { %s3003_s23 = scalar_lea.hbm %s3463_s0, 1024  ;;  %p4761_p4 = scmp.ne.s32.totalorder %s4752_s2, 0 }
  0x8f   : > { %p3004_p13 = scmp.ne.s32.totalorder %s3463_s0, %s3003_s23  ;;  %s3008_s16 = scalar_lea.hbm %s4695_s4, 2048 }
  0x90   : > { %p4762_p2 = pneg %p4761_p4  ;;  %p3009_p6 = scmp.lt.u32.totalorder %s3463_s0, %s4695_s4 }
  0x91   : > { %p3010_p5 = scmp.lt.u32.totalorder %s3008_s16, %s3003_s23  ;;  %p3012_p1 = scmp.lt.u32.totalorder %s3003_s23, %s3463_s0 }
  0x92   : > { %p3006_p12 = pnand %p3004_p13, %p4762_p2 }
  0x93   : > { %p3011_p7 = por %p3010_p5, %p3009_p6 }
  0x94   : > { %p3007_p8 = pneg %p3006_p12 }
  0x95   : > { %p3013_p10 = por %p3012_p1, %p3011_p7 }
  0x97   : > { %p3014_p9 = pnand %p3013_p10, %p3007_p8 }
  0x99   : > { %3017 = shalt.err (!%p3014_p9)
}
  0x9a   : > { %s3018_s5 = scalar_lea.vmem %s3465_s1, 1024  ;;  %p4763_p11 = pmov %p4762_p2 }
  0x9b   : > { %p3019_p3 = scmp.ne.s32.totalorder %s3465_s1, %s3018_s5  ;;  %s3148_s20 = smov [#allocation8]  }
  0x9c   : > { %s3023_s3 = sshll.u32 %s3148_s20, 4  ;;  %s3024_s3 = int_to_ptr.vmem [resolvable:$false] %s3023_s3 }
  0x9d   : > { %p3021_p0 = pnand %p3019_p3, %p4763_p11  ;;  %s3025_s29 = scalar_lea.vmem %s3024_s3, 2048 }
  0x9e   : > { %p3026_p2 = scmp.lt.s32.totalorder %s3465_s1, %s3024_s3  ;;  %p3027_p12 = scmp.lt.s32.totalorder %s3025_s29, %s3018_s5 }
  0x9f   : > { %p3022_p13 = pneg %p3021_p0 }
  0xa0   : > { %p3028_p6 = por %p3027_p12, %p3026_p2 }
  0xa2   : > { %p3029_p5 = pnand %p3028_p6, %p3022_p13 }
  0xa4   : > { %3032 = shalt.err (!%p3029_p5)
}
  0xa5   : > { %s4764_s10 = smov 8   ;;  %s4765_s12 = smov 128  }
  0xa6   : > { %2770 = dma.hbm_to_vmem [thread:$0]  (!%p4761_p4), %s3463_s0, 1024, %s3465_s1, %s3316_s6, %s4765_s12, %s4765_s12, %s4764_s10  }
  0xa7   : > { %p4766_p8 = scmp.ne.s32.totalorder %s4758_s18, 0 }
  0xa9   : > { %368 = sbr.rel (%p4766_p8) target bundleno = 975 (0x3cf), region = 40 }
  0xb0   : > { %s370_s23 = sand.u32 1, %s3407_s19   ;;  %s3519_s7 = sand.u32 1, %s3115_s28  }
  0xb1   : > { %s2435_s17 = sshll.u32 %s3519_s7, 6  ;;  %s371_s2 = scalar_lea.sflag [#allocation3], %s370_s23 }
  0xb2   : > { %s3524_s16 = scalar_lea.vmem [#allocation2], %s2435_s17  ;;  %p4767_p7 = scmp.ne.s32.totalorder %s4753_s8, 0 }
  0xb4   : > { %3078 = dma.done.wait (%p4767_p7), %s371_s2, 1024  }
  0xb5   : > { %3080 = vsyncadd (%p4767_p7), %s371_s2, 4294966272  ;;  %p4768_p4 = scmp.eq.s32.totalorder %s3407_s19, 0 }
  0xb7   : > { %3082 = dma.done.wait (%p4768_p4), [#allocation6], 24576   ;;  %p4769_p1 = pmov %p4768_p4 }
  0xb8   : > { %s385_s0 = sand.u32 1, %s3103_s25   ;;  %p4770_p10 = scmp.ne.s32.totalorder %s4754_s14, 0 }
  0xb9   : > { %3084 = vsyncadd (%p4769_p1), [#allocation6], 4294942720  ;;  %s3535_s6 = sshll.u32 %s385_s0, 6 }
  0xba   : > { %s3538_s1 = scalar_lea.vmem [#allocation7], %s3535_s6 }
  0xbb   : > { %3086 = dma.done.wait (%p4770_p10), %s371_s2, 2048  }
  0xbc   : > { %3088 = vsyncadd (%p4770_p10), %s371_s2, 4294965248  ;;  %v3545_v0 = vld [vmem:[%s3524_s16] sm:$0xff]  ;;  %v3548_v1 = vld [vmem:[%s3524_s16 + $0x8] sm:$0xff]  ;;  %s4771_s18 = sld [smem:[#allocation46_spill]]  ;;  %s3718_s21 = sshll.u32 %s3519_s7, 8 }
  0xbd   : > { %v3551_v2 = vld [vmem:[%s3524_s16 + $0x10] sm:$0xff]  ;;  %v464_v3 = vmul.f32 %v3545_v0, %v3545_v0  ;;  %v3558_v5 = vld [vmem:[%s3524_s16 + $0x18] sm:$0xff]  ;;  %v3561_v6 = vld [vmem:[%s3524_s16 + $0x20] sm:$0xff]  ;;  %v465_v9 = vmul.f32 %v3548_v1, %v3548_v1  ;;  %s3723_s22 = scalar_lea.vmem [#allocation12], %s3718_s21  ;;  %s3150_s5 = smov 32  }
  0xbe   : > { %v466_v4 = vmul.f32 %v3551_v2, %v3551_v2  ;;  %v3564_v7 = vld [vmem:[%s3524_s16 + $0x28] sm:$0xff]  ;;  %v467_v10 = vmul.f32 %v3558_v5, %v3558_v5  ;;  %v539_v12 = vld [vmem:[#allocation5 + $0x18] sm:$0xff]  ;;  %v536_v16 = vld [vmem:[#allocation5] sm:$0xff]  ;;  %v468_v30 = vmul.f32 %v3561_v6, %v3561_v6  ;;  %s3151_s20 = smov 96   ;;  %s4009_s3 = scalar_lea.vmem [#allocation8], %s3535_s6 }
  0xbf   : > { %v537_v8 = vld [vmem:[#allocation5 + $0x8] sm:$0xff]  ;;  %472 = vadd.xlane.f32.xlu0 %v464_v3  ;;  %v551_v13 = vld [vmem:[#allocation5 + $0x78] sm:$0xff]  ;;  %v548_v17 = vld [vmem:[#allocation5 + $0x60] sm:$0xff]  ;;  %v469_v31 = vmul.f32 %v3564_v7, %v3564_v7  ;;  %s4034_s29 = scalar_lea.vmem [#allocation9], %s3718_s21  ;;  %s4057_s10 = scalar_lea.vmem [#allocation10], %s3718_s21 }
  0xc0   : > { %476 = vadd.xlane.f32.xlu1 %v466_v4  ;;  %v549_v11 = vld [vmem:[#allocation5 + $0x68] sm:$0xff]  ;;  %v2563_v15 = vpack.c.bf16 %v551_v13, %v539_v12  ;;  %v538_v18 = vld [vmem:[#allocation5 + $0x10] sm:$0xff]  ;;  %v2533_v19 = vpack.c.bf16 %v548_v17, %v536_v16  ;;  %v3574_v24 = vld [vmem:[%s3524_s16 + $0x38] sm:$0xff]  ;;  %s2044_s12 = scalar_lea.sflag [#allocation4], %s3519_s7  ;;  %s4587_s17 = scalar_lea.sflag [#allocation11], %s370_s23 }
  0xc1   : > { %v2531_v14 = vpack.c.bf16 %v549_v11, %v537_v8  ;;  %v550_v20 = vld [vmem:[#allocation5 + $0x70] sm:$0xff]  ;;  %v561_v21 = vld [vmem:[#allocation5 + $0xc8] sm:$0xff]  ;;  %v563_v27 = vld [vmem:[#allocation5 + $0xd8] sm:$0xff]  ;;  %v471_v50 = vmul.f32 %v3574_v24, %v3574_v24 }
  0xc2   : > { %v573_v22 = vld [vmem:[#allocation5 + $0x128] sm:$0xff]  ;;  %v3571_v23 = vld [vmem:[%s3524_s16 + $0x30] sm:$0xff]  ;;  %2564 = vmatprep.subr.bf16.mxu1 %v2563_v15  ;;  %v2565_v25 = vpack.c.bf16 %v550_v20, %v538_v18  ;;  %v575_v28 = vld [vmem:[#allocation5 + $0x138] sm:$0xff] }
  0xc3   : > { %2532 = vmatprep.subr.bf16.mxu0 %v2531_v14  ;;  %v2535_v26 = vpack.c.bf16 %v573_v22, %v561_v21  ;;  %v560_v29 = vld [vmem:[#allocation5 + $0xc0] sm:$0xff]  ;;  %474 = vadd.xlane.f32.xlu0 %v465_v9  ;;  %v2567_v32 = vpack.c.bf16 %v575_v28, %v563_v27  ;;  %v562_v34 = vld [vmem:[#allocation5 + $0xd0] sm:$0xff]  ;;  %v585_v38 = vld [vmem:[#allocation5 + $0x188] sm:$0xff]  ;;  %v470_v49 = vmul.f32 %v3571_v23, %v3571_v23 }
  0xc4   : > { %478 = vadd.xlane.f32.xlu1 %v467_v10  ;;  %v572_v33 = vld [vmem:[#allocation5 + $0x120] sm:$0xff]  ;;  %v574_v35 = vld [vmem:[#allocation5 + $0x130] sm:$0xff]  ;;  %2534 = vmatpush1.bf16.msra.mxu0 %v2533_v19  ;;  %v597_v39 = vld [vmem:[#allocation5 + $0x1e8] sm:$0xff] }
  0xc5   : > { %2566 = vmatpush1.bf16.msra.mxu1 %v2565_v25  ;;  %v2537_v36 = vpack.c.bf16 %v572_v33, %v560_v29  ;;  %v2569_v37 = vpack.c.bf16 %v574_v35, %v562_v34  ;;  %v587_v40 = vld [vmem:[#allocation5 + $0x198] sm:$0xff]  ;;  %2536 = vmatprep.subr.bf16.mxu0 %v2535_v26  ;;  %v2539_v41 = vpack.c.bf16 %v597_v39, %v585_v38  ;;  %v584_v43 = vld [vmem:[#allocation5 + $0x180] sm:$0xff]  ;;  %v586_v46 = vld [vmem:[#allocation5 + $0x190] sm:$0xff] }
  0xc6   : > { %2568 = vmatprep.subr.bf16.mxu1 %v2567_v32  ;;  %v599_v42 = vld [vmem:[#allocation5 + $0x1f8] sm:$0xff]  ;;  %v596_v44 = vld [vmem:[#allocation5 + $0x1e0] sm:$0xff]  ;;  %v598_v47 = vld [vmem:[#allocation5 + $0x1f0] sm:$0xff] }
  0xc7   : > { %v2571_v45 = vpack.c.bf16 %v599_v42, %v587_v40  ;;  %v609_v48 = vld [vmem:[#allocation5 + $0x248] sm:$0xff]  ;;  %480 = vadd.xlane.f32.xlu0 %v468_v30  ;;  %v611_v52 = vld [vmem:[#allocation5 + $0x258] sm:$0xff]  ;;  %v2541_v54 = vpack.c.bf16 %v596_v44, %v584_v43  ;;  %v2573_v55 = vpack.c.bf16 %v598_v47, %v586_v46  ;;  %v608_v58 = vld [vmem:[#allocation5 + $0x240] sm:$0xff] }
  0xc8   : > { %482 = vadd.xlane.f32.xlu1 %v469_v31  ;;  %v621_v51 = vld [vmem:[#allocation5 + $0x2a8] sm:$0xff]  ;;  %v623_v53 = vld [vmem:[#allocation5 + $0x2b8] sm:$0xff]  ;;  %2538 = vmatpush1.bf16.msra.mxu0 %v2537_v36  ;;  %v620_v59 = vld [vmem:[#allocation5 + $0x2a0] sm:$0xff] }
  0xc9   : > { %2570 = vmatpush1.bf16.msra.mxu1 %v2569_v37  ;;  %2540 = vmatprep.subr.bf16.mxu0 %v2539_v41  ;;  %v2543_v56 = vpack.c.bf16 %v621_v51, %v609_v48  ;;  %v2575_v57 = vpack.c.bf16 %v623_v53, %v611_v52  ;;  %v610_v60 = vld [vmem:[#allocation5 + $0x250] sm:$0xff]  ;;  %v2545_v62 = vpack.c.bf16 %v620_v59, %v608_v58  ;;  %v633_v3 = vld [vmem:[#allocation5 + $0x308] sm:$0xff]  ;;  %v635_v8 = vld [vmem:[#allocation5 + $0x318] sm:$0xff] }
  0xca   : > { %2572 = vmatprep.subr.bf16.mxu1 %v2571_v45  ;;  %v622_v61 = vld [vmem:[#allocation5 + $0x2b0] sm:$0xff]  ;;  %v645_v4 = vld [vmem:[#allocation5 + $0x368] sm:$0xff]  ;;  %v647_v10 = vld [vmem:[#allocation5 + $0x378] sm:$0xff] }
  0xcb   : > { %484 = vadd.xlane.f32.xlu0 %v470_v49  ;;  %v2577_v63 = vpack.c.bf16 %v622_v61, %v610_v60  ;;  %v2547_v9 = vpack.c.bf16 %v645_v4, %v633_v3  ;;  %v632_v11 = vld [vmem:[#allocation5 + $0x300] sm:$0xff]  ;;  %v2579_v13 = vpack.c.bf16 %v647_v10, %v635_v8  ;;  %v634_v14 = vld [vmem:[#allocation5 + $0x310] sm:$0xff]  ;;  %v657_v18 = vld [vmem:[#allocation5 + $0x3c8] sm:$0xff]  ;;  %v3149_v61 = vmov 0.0  }
  0xcc   : > { %486 = vadd.xlane.f32.xlu1 %v471_v50  ;;  %2542 = vmatpush1.bf16.msra.mxu0 %v2541_v54  ;;  %v644_v12 = vld [vmem:[#allocation5 + $0x360] sm:$0xff]  ;;  %v646_v15 = vld [vmem:[#allocation5 + $0x370] sm:$0xff]  ;;  %v669_v19 = vld [vmem:[#allocation5 + $0x428] sm:$0xff] }
  0xcd   : > { %2574 = vmatpush1.bf16.msra.mxu1 %v2573_v55  ;;  %2544 = vmatprep.subr.bf16.mxu0 %v2543_v56  ;;  %v2549_v16 = vpack.c.bf16 %v644_v12, %v632_v11  ;;  %v2581_v17 = vpack.c.bf16 %v646_v15, %v634_v14  ;;  %v659_v20 = vld [vmem:[#allocation5 + $0x3d8] sm:$0xff]  ;;  %v2551_v21 = vpack.c.bf16 %v669_v19, %v657_v18  ;;  %v656_v25 = vld [vmem:[#allocation5 + $0x3c0] sm:$0xff]  ;;  %v658_v28 = vld [vmem:[#allocation5 + $0x3d0] sm:$0xff] }
  0xce   : > { %2576 = vmatprep.subr.bf16.mxu1 %v2575_v57  ;;  %v671_v22 = vld [vmem:[#allocation5 + $0x438] sm:$0xff]  ;;  %v668_v26 = vld [vmem:[#allocation5 + $0x420] sm:$0xff]  ;;  %v670_v29 = vld [vmem:[#allocation5 + $0x430] sm:$0xff]  ;;  %792 = vmatprep.mubr.f32.mxu0 %v3149_v61 }
  0xcf   : > { %v2583_v27 = vpack.c.bf16 %v671_v22, %v659_v20  ;;  %v2553_v30 = vpack.c.bf16 %v668_v26, %v656_v25  ;;  %v2585_v31 = vpack.c.bf16 %v670_v29, %v658_v28  ;;  %v681_v32 = vld [vmem:[#allocation5 + $0x488] sm:$0xff]  ;;  %v683_v34 = vld [vmem:[#allocation5 + $0x498] sm:$0xff]  ;;  %v680_v37 = vld [vmem:[#allocation5 + $0x480] sm:$0xff]  ;;  %905 = vmatprep.mubr.f32.mxu1 %v3149_v61 }
  0xd0   : > { %2546 = vmatpush1.bf16.msra.mxu0 %v2545_v62  ;;  %v693_v33 = vld [vmem:[#allocation5 + $0x4e8] sm:$0xff]  ;;  %v695_v36 = vld [vmem:[#allocation5 + $0x4f8] sm:$0xff]  ;;  %v692_v38 = vld [vmem:[#allocation5 + $0x4e0] sm:$0xff] }
  0xd1   : > { %2578 = vmatpush1.bf16.msra.mxu1 %v2577_v63  ;;  %2548 = vmatprep.subr.bf16.mxu0 %v2547_v9  ;;  %v2555_v35 = vpack.c.bf16 %v693_v33, %v681_v32  ;;  %v2587_v39 = vpack.c.bf16 %v695_v36, %v683_v34  ;;  %v682_v40 = vld [vmem:[#allocation5 + $0x490] sm:$0xff]  ;;  %v2557_v42 = vpack.c.bf16 %v692_v38, %v680_v37  ;;  %v705_v44 = vld [vmem:[#allocation5 + $0x548] sm:$0xff]  ;;  %v707_v46 = vld [vmem:[#allocation5 + $0x558] sm:$0xff] }
  0xd2   : > { %2580 = vmatprep.subr.bf16.mxu1 %v2579_v13  ;;  %v694_v41 = vld [vmem:[#allocation5 + $0x4f0] sm:$0xff]  ;;  %v717_v45 = vld [vmem:[#allocation5 + $0x5a8] sm:$0xff]  ;;  %v719_v48 = vld [vmem:[#allocation5 + $0x5b8] sm:$0xff] }
  0xd3   : > { %v2589_v43 = vpack.c.bf16 %v694_v41, %v682_v40  ;;  %v2559_v47 = vpack.c.bf16 %v717_v45, %v705_v44  ;;  %v704_v49 = vld [vmem:[#allocation5 + $0x540] sm:$0xff]  ;;  %v2591_v51 = vpack.c.bf16 %v719_v48, %v707_v46  ;;  %v706_v52 = vld [vmem:[#allocation5 + $0x550] sm:$0xff]  ;;  %v541_v56 = vld [vmem:[#allocation5 + $0x28] sm:$0xff] }
  0xd4   : > { %2550 = vmatpush1.bf16.msra.mxu0 %v2549_v16  ;;  %v716_v50 = vld [vmem:[#allocation5 + $0x5a0] sm:$0xff]  ;;  %v718_v53 = vld [vmem:[#allocation5 + $0x5b0] sm:$0xff]  ;;  %v553_v57 = vld [vmem:[#allocation5 + $0x88] sm:$0xff] }
  0xd5   : > { %2582 = vmatpush1.bf16.msra.mxu1 %v2581_v17  ;;  %2552 = vmatprep.subr.bf16.mxu0 %v2551_v21  ;;  %v2561_v54 = vpack.c.bf16 %v716_v50, %v704_v49  ;;  %v2593_v55 = vpack.c.bf16 %v718_v53, %v706_v52  ;;  %v543_v58 = vld [vmem:[#allocation5 + $0x38] sm:$0xff]  ;;  %v2595_v59 = vpack.c.bf16 %v553_v57, %v541_v56  ;;  %v540_v25 = vld [vmem:[#allocation5 + $0x20] sm:$0xff]  ;;  %v554_v28 = vld [vmem:[#allocation5 + $0x90] sm:$0xff] }
  0xd6   : > { %2584 = vmatprep.subr.bf16.mxu1 %v2583_v27  ;;  %v555_v60 = vld [vmem:[#allocation5 + $0x98] sm:$0xff]  ;;  %v552_v26 = vld [vmem:[#allocation5 + $0x80] sm:$0xff]  ;;  %v542_v27 = vld [vmem:[#allocation5 + $0x30] sm:$0xff] }
  0xd7   : > { %v2627_v62 = vpack.c.bf16 %v555_v60, %v543_v58  ;;  %v565_v32 = vld [vmem:[#allocation5 + $0xe8] sm:$0xff]  ;;  %v567_v36 = vld [vmem:[#allocation5 + $0xf8] sm:$0xff]  ;;  %v2597_v40 = vpack.c.bf16 %v552_v26, %v540_v25  ;;  %v2629_v41 = vpack.c.bf16 %v554_v28, %v542_v27  ;;  %v576_v45 = vld [vmem:[#allocation5 + $0x140] sm:$0xff] }
  0xd8   : > { %2554 = vmatpush1.bf16.msra.mxu0 %v2553_v30  ;;  %v3589_v30 = vld [vmem:[%s4771_s18] ss:$0 sm:$0xff]  ;;  %v577_v33 = vld [vmem:[#allocation5 + $0x148] sm:$0xff]  ;;  %v579_v37 = vld [vmem:[#allocation5 + $0x158] sm:$0xff] }
  0xd9   : > { %2586 = vmatpush1.bf16.msra.mxu1 %v2585_v31  ;;  %2556 = vmatprep.subr.bf16.mxu0 %v2555_v35  ;;  %v2599_v44 = vpack.c.bf16 %v577_v33, %v565_v32  ;;  %v566_v46 = vld [vmem:[#allocation5 + $0xf0] sm:$0xff]  ;;  %v2631_v49 = vpack.c.bf16 %v579_v37, %v567_v36  ;;  %v603_v56 = vld [vmem:[#allocation5 + $0x218] sm:$0xff]  ;;  %v588_v60 = vld [vmem:[#allocation5 + $0x1a0] sm:$0xff] }
  0xda   : > { %2588 = vmatprep.subr.bf16.mxu1 %v2587_v39  ;;  %v637_v25 = vld [vmem:[#allocation5 + $0x328] sm:$0xff]  ;;  %v648_v36 = vld [vmem:[#allocation5 + $0x380] sm:$0xff]  ;;  %v638_v37 = vld [vmem:[#allocation5 + $0x330] sm:$0xff] }
  0xdb   : > { %v649_v28 = vld [vmem:[#allocation5 + $0x388] sm:$0xff] }
  0xdc   : > { %2558 = vmatpush1.bf16.msra.mxu0 %v2557_v42  ;;  %v564_v42 = vld [vmem:[#allocation5 + $0xe0] sm:$0xff] }
  0xdd   : > { %2590 = vmatpush1.bf16.msra.mxu1 %v2589_v43  ;;  %2560 = vmatprep.subr.bf16.mxu0 %v2559_v47  ;;  %v578_v47 = vld [vmem:[#allocation5 + $0x150] sm:$0xff]  ;;  %v2601_v58 = vpack.c.bf16 %v576_v45, %v564_v42  ;;  %v663_v45 = vld [vmem:[#allocation5 + $0x3f8] sm:$0xff] }
  0xde   : > { %2592 = vmatprep.subr.bf16.mxu1 %v2591_v51 }
  0xe0   : > { %2562 = vmatpush1.bf16.msra.mxu0 %v2561_v54  ;;  %v601_v54 = vld [vmem:[#allocation5 + $0x208] sm:$0xff] }
  0xe1   : > { %2594 = vmatpush1.bf16.msra.mxu1 %v2593_v55  ;;  %2596 = vmatprep.subr.bf16.mxu0 %v2595_v59  ;;  %v591_v55 = vld [vmem:[#allocation5 + $0x1b8] sm:$0xff]  ;;  %v2633_v59 = vpack.c.bf16 %v578_v47, %v566_v46 }
  0xe2   : > { %2628 = vmatprep.subr.bf16.mxu1 %v2627_v62  ;;  %v675_v46 = vld [vmem:[#allocation5 + $0x458] sm:$0xff] }
 0x14c   : > { %v473_v63 = vpop.xlane.xlu0 %472 }
 0x14d   : > { %v477_v3 = vpop.xlane.xlu1 %476  ;;  %v489_v4 = vmul.f32 0.0078125, %v473_v63  ;;  %v602_v63 = vld [vmem:[#allocation5 + $0x210] sm:$0xff] }
 0x14e   : > { %v491_v8 = vmul.f32 0.0078125, %v477_v3 }
 0x14f   : > { %v497_v9 = vadd.f32 1.1920929e-07, %v489_v4 }
 0x150   : > { %v499_v10 = vadd.f32 1.1920929e-07, %v491_v8  ;;  %v475_v11 = vpop.xlane.xlu0 %474  ;;  %v2635_v8 = vpack.c.bf16 %v603_v56, %v591_v55 }
 0x151   : > { %v479_v12 = vpop.xlane.xlu1 %478  ;;  %2899 = vrsqrt.f32 %v497_v9  ;;  %v490_v13 = vmul.f32 0.0078125, %v475_v11  ;;  %v613_v9 = vld [vmem:[#allocation5 + $0x268] sm:$0xff] }
 0x152   : > { %v492_v14 = vmul.f32 0.0078125, %v479_v12  ;;  %2901 = vrsqrt.f32 %v499_v10  ;;  %v625_v12 = vld [vmem:[#allocation5 + $0x2c8] sm:$0xff] }
 0x153   : > { %v498_v15 = vadd.f32 1.1920929e-07, %v490_v13  ;;  %v615_v13 = vld [vmem:[#allocation5 + $0x278] sm:$0xff] }
 0x154   : > { %v500_v16 = vadd.f32 1.1920929e-07, %v492_v14  ;;  %v481_v17 = vpop.xlane.xlu0 %480  ;;  %v627_v14 = vld [vmem:[#allocation5 + $0x2d8] sm:$0xff] }
 0x155   : > { %v483_v18 = vpop.xlane.xlu1 %482  ;;  %2903 = vrsqrt.f32 %v498_v15  ;;  %v493_v19 = vmul.f32 0.0078125, %v481_v17 }
 0x156   : > { %2905 = vrsqrt.f32 %v500_v16  ;;  %v494_v21 = vmul.f32 0.0078125, %v483_v18  ;;  %v612_v18 = vld [vmem:[#allocation5 + $0x260] sm:$0xff] }
 0x157   : > { %v501_v20 = vadd.f32 1.1920929e-07, %v493_v19  ;;  %v624_v19 = vld [vmem:[#allocation5 + $0x2c0] sm:$0xff] }
 0x158   : > { %v485_v22 = vpop.xlane.xlu0 %484  ;;  %v502_v31 = vadd.f32 1.1920929e-07, %v494_v21  ;;  %v2607_v21 = vpack.c.bf16 %v625_v12, %v613_v9  ;;  %v2609_v33 = vpack.c.bf16 %v624_v19, %v612_v18  ;;  %v708_v19 = vld [vmem:[#allocation5 + $0x560] sm:$0xff] }
 0x159   : > { %2907 = vrsqrt.f32 %v501_v20  ;;  %v495_v34 = vmul.f32 0.0078125, %v485_v22  ;;  %v487_v38 = vpop.xlane.xlu1 %486  ;;  %v614_v20 = vld [vmem:[#allocation5 + $0x270] sm:$0xff]  ;;  %v2639_v22 = vpack.c.bf16 %v627_v14, %v615_v13  ;;  %v721_v14 = vld [vmem:[#allocation5 + $0x5c8] sm:$0xff] }
 0x15a   : > { %2909 = vrsqrt.f32 %v502_v31  ;;  %v496_v51 = vmul.f32 0.0078125, %v487_v38  ;;  %v651_v31 = vld [vmem:[#allocation5 + $0x398] sm:$0xff]  ;;  %v2611_v38 = vpack.c.bf16 %v649_v28, %v637_v25  ;;  %v545_v25 = vld [vmem:[#allocation5 + $0x48] sm:$0xff] }
 0x15b   : > { %v2900_v29 = vpop.eup %2899  ;;  %v503_v50 = vadd.f32 1.1920929e-07, %v495_v34  ;;  %v557_v28 = vld [vmem:[#allocation5 + $0xa8] sm:$0xff] }
 0x15c   : > { %v513_v35 = vmul.f32 %v2900_v29, %v3545_v0  ;;  %v2902_v39 = vpop.eup %2901  ;;  %v589_v0 = vld [vmem:[#allocation5 + $0x1a8] sm:$0xff]  ;;  %v504_v3 = vadd.f32 1.1920929e-07, %v496_v51  ;;  %v639_v29 = vld [vmem:[#allocation5 + $0x338] sm:$0xff]  ;;  %v672_v51 = vld [vmem:[#allocation5 + $0x440] sm:$0xff] }
 0x15d   : > { %v515_v53 = vmul.f32 %v2902_v39, %v3551_v2  ;;  %v590_v2 = vld [vmem:[#allocation5 + $0x1b0] sm:$0xff]  ;;  %2911 = vrsqrt.f32 %v503_v50  ;;  %v2603_v4 = vpack.c.bf16 %v601_v54, %v589_v0  ;;  %v2643_v39 = vpack.c.bf16 %v651_v31, %v639_v29  ;;  %v660_v50 = vld [vmem:[#allocation5 + $0x3e0] sm:$0xff]  ;;  %v685_v54 = vld [vmem:[#allocation5 + $0x4a8] sm:$0xff] }
 0x15e   : > { %v3593_v43 = vmul.f32 %v3589_v30, %v513_v35  ;;  %v2637_v17 = vpack.c.bf16 %v602_v63, %v590_v2  ;;  %2913 = vrsqrt.f32 %v504_v3  ;;  %v636_v35 = vld [vmem:[#allocation5 + $0x320] sm:$0xff]  ;;  %v662_v0 = vld [vmem:[#allocation5 + $0x3f0] sm:$0xff]  ;;  %v547_v29 = vld [vmem:[#allocation5 + $0x58] sm:$0xff] }
 0x15f   : > { %v2904_v48 = vpop.eup %2903  ;;  %v3605_v10 = vmul.f32 %v3589_v30, %v515_v53  ;;  %v2647_v53 = vpack.c.bf16 %v675_v46, %v663_v45  ;;  %v684_v63 = vld [vmem:[#allocation5 + $0x4a0] sm:$0xff]  ;;  %v559_v31 = vld [vmem:[#allocation5 + $0xb8] sm:$0xff] }
 0x160   : > { %v514_v52 = vmul.f32 %v2904_v48, %v3548_v1  ;;  %793 = vmatmul.mubr.f32.vlgmr.msra.gmra.mrb[0].mxu0 %v3593_v43  ;;  %906 = vmatmul.mubr.f32.vlgmr.msra.gmra.mrb[0].mxu1 %v3593_v43  ;;  %v2906_v57 = vpop.eup %2905  ;;  %v600_v1 = vld [vmem:[#allocation5 + $0x200] sm:$0xff]  ;;  %v2613_v48 = vpack.c.bf16 %v648_v36, %v636_v35  ;;  %v546_v36 = vld [vmem:[#allocation5 + $0x50] sm:$0xff] }
 0x161   : > { %2598 = vmatpush1.bf16.msra.mxu0 %v2597_v40  ;;  %2630 = vmatpush1.bf16.msra.mxu1 %v2629_v41  ;;  %v516_v11 = vmul.f32 %v2906_v57, %v3558_v5  ;;  %v2605_v16 = vpack.c.bf16 %v600_v1, %v588_v60  ;;  %v626_v5 = vld [vmem:[#allocation5 + $0x2d0] sm:$0xff]  ;;  %v661_v40 = vld [vmem:[#allocation5 + $0x3e8] sm:$0xff]  ;;  %v2617_v1 = vpack.c.bf16 %v672_v51, %v660_v50  ;;  %v696_v3 = vld [vmem:[#allocation5 + $0x500] sm:$0xff] }
 0x162   : > { %v3600_v62 = vmul.f32 %v3589_v30, %v514_v52  ;;  %798 = vmatprep.mubr.f32.mxu0 %v3149_v61  ;;  %911 = vmatprep.mubr.f32.mxu1 %v3149_v61  ;;  %v2641_v34 = vpack.c.bf16 %v626_v5, %v614_v20  ;;  %v697_v57 = vld [vmem:[#allocation5 + $0x508] sm:$0xff]  ;;  %v720_v20 = vld [vmem:[#allocation5 + $0x5c0] sm:$0xff]  ;;  %v710_v5 = vld [vmem:[#allocation5 + $0x570] sm:$0xff] }
 0x163   : > { %2600 = vmatprep.subr.bf16.mxu0 %v2599_v44  ;;  %2632 = vmatprep.subr.bf16.mxu1 %v2631_v49  ;;  %v2908_v15 = vpop.eup %2907  ;;  %v3613_v26 = vmul.f32 %v3589_v30, %v516_v11  ;;  %v673_v44 = vld [vmem:[#allocation5 + $0x448] sm:$0xff]  ;;  %v556_v35 = vld [vmem:[#allocation5 + $0xa0] sm:$0xff] }
 0x164   : > { %799 = vmatmul.mubr.f32.gmra.mrb[2].mxu0 %v3600_v62  ;;  %912 = vmatmul.mubr.f32.gmra.mrb[2].mxu1 %v3600_v62  ;;  %v517_v27 = vmul.f32 %v2908_v15, %v3561_v6  ;;  %v2910_v32 = vpop.eup %2909  ;;  %v650_v6 = vld [vmem:[#allocation5 + $0x390] sm:$0xff]  ;;  %v2615_v52 = vpack.c.bf16 %v673_v44, %v661_v40  ;;  %v709_v11 = vld [vmem:[#allocation5 + $0x568] sm:$0xff]  ;;  %v711_v15 = vld [vmem:[#allocation5 + $0x578] sm:$0xff] }
 0x165   : > { %2602 = vmatpush1.bf16.msra.mxu0 %v2601_v58  ;;  %2634 = vmatpush1.bf16.msra.mxu1 %v2633_v59  ;;  %v518_v42 = vmul.f32 %v2910_v32, %v3564_v7  ;;  %v2645_v49 = vpack.c.bf16 %v650_v6, %v638_v37  ;;  %v674_v7 = vld [vmem:[#allocation5 + $0x450] sm:$0xff]  ;;  %v687_v58 = vld [vmem:[#allocation5 + $0x4b8] sm:$0xff]  ;;  %v2625_v32 = vpack.c.bf16 %v720_v20, %v708_v19  ;;  %v568_v46 = vld [vmem:[#allocation5 + $0x100] sm:$0xff] }
 0x166   : > { %804 = vmatprep.mubr.f32.mxu0 %v3149_v61  ;;  %917 = vmatprep.mubr.f32.mxu1 %v3149_v61  ;;  %v3621_v41 = vmul.f32 %v3589_v30, %v517_v27  ;;  %v699_v59 = vld [vmem:[#allocation5 + $0x518] sm:$0xff]  ;;  %v2649_v2 = vpack.c.bf16 %v674_v7, %v662_v0  ;;  %v2659_v37 = vpack.c.bf16 %v557_v28, %v545_v25  ;;  %v593_v0 = vld [vmem:[#allocation5 + $0x1c8] sm:$0xff]  ;;  %v652_v25 = vld [vmem:[#allocation5 + $0x3a0] sm:$0xff] }
 0x167   : > { %2604 = vmatprep.subr.bf16.mxu0 %v2603_v4  ;;  %2636 = vmatprep.subr.bf16.mxu1 %v2635_v8  ;;  %v2912_v47 = vpop.eup %2911  ;;  %v3629_v55 = vmul.f32 %v3589_v30, %v518_v42  ;;  %v686_v4 = vld [vmem:[#allocation5 + $0x4b0] sm:$0xff]  ;;  %v2619_v8 = vpack.c.bf16 %v697_v57, %v685_v54  ;;  %v2651_v9 = vpack.c.bf16 %v699_v59, %v687_v58  ;;  %v571_v40 = vld [vmem:[#allocation5 + $0x118] sm:$0xff]  ;;  %v605_v7 = vld [vmem:[#allocation5 + $0x228] sm:$0xff] }
 0x168   : > { %805 = vmatmul.mubr.f32.gmra.mrb[4].mxu0 %v3605_v10  ;;  %918 = vmatmul.mubr.f32.gmra.mrb[4].mxu1 %v3605_v10  ;;  %v519_v56 = vmul.f32 %v2912_v47, %v3571_v23  ;;  %v2914_v60 = vpop.eup %2913  ;;  %v698_v23 = vld [vmem:[#allocation5 + $0x510] sm:$0xff]  ;;  %v2691_v6 = vpack.c.bf16 %v559_v31, %v547_v29  ;;  %v583_v42 = vld [vmem:[#allocation5 + $0x178] sm:$0xff]  ;;  %v580_v47 = vld [vmem:[#allocation5 + $0x160] sm:$0xff] }
 0x169   : > { %2606 = vmatpush1.bf16.msra.mxu0 %v2605_v16  ;;  %2638 = vmatpush1.bf16.msra.mxu1 %v2637_v17  ;;  %v520_v13 = vmul.f32 %v2914_v60, %v3574_v24  ;;  %v723_v16 = vld [vmem:[#allocation5 + $0x5d8] sm:$0xff]  ;;  %v2621_v17 = vpack.c.bf16 %v696_v3, %v684_v63  ;;  %v2653_v18 = vpack.c.bf16 %v698_v23, %v686_v4  ;;  %v592_v57 = vld [vmem:[#allocation5 + $0x1c0] sm:$0xff]  ;;  %v594_v59 = vld [vmem:[#allocation5 + $0x1d0] sm:$0xff] }
 0x16a   : > { %810 = vmatprep.mubr.f32.mxu0 %v3149_v61  ;;  %923 = vmatprep.mubr.f32.mxu1 %v3149_v61  ;;  %v3637_v12 = vmul.f32 %v3589_v30, %v519_v56  ;;  %v2623_v24 = vpack.c.bf16 %v721_v14, %v709_v11  ;;  %v2695_v51 = vpack.c.bf16 %v583_v42, %v571_v40  ;;  %v604_v58 = vld [vmem:[#allocation5 + $0x220] sm:$0xff]  ;;  %v606_v60 = vld [vmem:[#allocation5 + $0x230] sm:$0xff]  ;;  %v617_v63 = vld [vmem:[#allocation5 + $0x288] sm:$0xff] }
 0x16b   : > { %2608 = vmatprep.subr.bf16.mxu0 %v2607_v21  ;;  %2640 = vmatprep.subr.bf16.mxu1 %v2639_v22  ;;  %v722_v21 = vld [vmem:[#allocation5 + $0x5d0] sm:$0xff]  ;;  %v2655_v22 = vpack.c.bf16 %v723_v16, %v711_v15  ;;  %v3645_v27 = vmul.f32 %v3589_v30, %v520_v13  ;;  %v2665_v54 = vpack.c.bf16 %v580_v47, %v568_v46  ;;  %v629_v3 = vld [vmem:[#allocation5 + $0x2e8] sm:$0xff]  ;;  %v619_v4 = vld [vmem:[#allocation5 + $0x298] sm:$0xff] }
 0x16c   : > { %811 = vmatmul.mubr.f32.gmra.mrb[6].mxu0 %v3613_v26  ;;  %924 = vmatmul.mubr.f32.gmra.mrb[6].mxu1 %v3613_v26  ;;  %v558_v30 = vld [vmem:[#allocation5 + $0xb0] sm:$0xff]  ;;  %v631_v23 = vld [vmem:[#allocation5 + $0x2f8] sm:$0xff]  ;;  %v616_v11 = vld [vmem:[#allocation5 + $0x280] sm:$0xff]  ;;  %v2671_v16 = vpack.c.bf16 %v629_v3, %v617_v63 }
 0x16d   : > { %2610 = vmatpush1.bf16.msra.mxu0 %v2609_v33  ;;  %2642 = vmatpush1.bf16.msra.mxu1 %v2641_v34  ;;  %v2657_v33 = vpack.c.bf16 %v722_v21, %v710_v5  ;;  %v544_v34 = vld [vmem:[#allocation5 + $0x40] sm:$0xff]  ;;  %v2693_v45 = vpack.c.bf16 %v558_v30, %v546_v36  ;;  %v618_v14 = vld [vmem:[#allocation5 + $0x290] sm:$0xff]  ;;  %v653_v19 = vld [vmem:[#allocation5 + $0x3a8] sm:$0xff] }
 0x16e   : > { %816 = vmatprep.mubr.f32.mxu0 %v3149_v61  ;;  %929 = vmatprep.mubr.f32.mxu1 %v3149_v61  ;;  %v2661_v44 = vpack.c.bf16 %v556_v35, %v544_v34  ;;  %v628_v13 = vld [vmem:[#allocation5 + $0x2e0] sm:$0xff]  ;;  %v630_v15 = vld [vmem:[#allocation5 + $0x2f0] sm:$0xff]  ;;  %v643_v20 = vld [vmem:[#allocation5 + $0x358] sm:$0xff] }
 0x16f   : > { %2612 = vmatprep.subr.bf16.mxu0 %v2611_v38  ;;  %2644 = vmatprep.subr.bf16.mxu1 %v2643_v39  ;;  %v569_v38 = vld [vmem:[#allocation5 + $0x108] sm:$0xff]  ;;  %v655_v5 = vld [vmem:[#allocation5 + $0x3b8] sm:$0xff]  ;;  %v2673_v21 = vpack.c.bf16 %v628_v13, %v616_v11  ;;  %v642_v28 = vld [vmem:[#allocation5 + $0x350] sm:$0xff] }
 0x170   : > { %817 = vmatmul.mubr.f32.gmra.mrb[8].mxu0 %v3621_v41  ;;  %930 = vmatmul.mubr.f32.gmra.mrb[8].mxu1 %v3621_v41  ;;  %v581_v39 = vld [vmem:[#allocation5 + $0x168] sm:$0xff]  ;;  %v654_v29 = vld [vmem:[#allocation5 + $0x3b0] sm:$0xff]  ;;  %v667_v35 = vld [vmem:[#allocation5 + $0x418] sm:$0xff] }
 0x171   : > { %2614 = vmatpush1.bf16.msra.mxu0 %v2613_v48  ;;  %2646 = vmatpush1.bf16.msra.mxu1 %v2645_v49  ;;  %v570_v48 = vld [vmem:[#allocation5 + $0x110] sm:$0xff]  ;;  %v2663_v50 = vpack.c.bf16 %v581_v39, %v569_v38  ;;  %v677_v34 = vld [vmem:[#allocation5 + $0x468] sm:$0xff]  ;;  %v679_v36 = vld [vmem:[#allocation5 + $0x478] sm:$0xff] }
 0x172   : > { %822 = vmatprep.mubr.f32.mxu0 %v3149_v61  ;;  %935 = vmatprep.mubr.f32.mxu1 %v3149_v61  ;;  %v582_v49 = vld [vmem:[#allocation5 + $0x170] sm:$0xff]  ;;  %v676_v38 = vld [vmem:[#allocation5 + $0x460] sm:$0xff]  ;;  %v701_v46 = vld [vmem:[#allocation5 + $0x528] sm:$0xff] }
 0x173   : > { %2616 = vmatprep.subr.bf16.mxu0 %v2615_v52  ;;  %2648 = vmatprep.subr.bf16.mxu1 %v2647_v53  ;;  %v595_v52 = vld [vmem:[#allocation5 + $0x1d8] sm:$0xff]  ;;  %v2697_v56 = vpack.c.bf16 %v582_v49, %v570_v48  ;;  %v666_v39 = vld [vmem:[#allocation5 + $0x410] sm:$0xff]  ;;  %v724_v63 = vld [vmem:[#allocation5 + $0x5e0] sm:$0xff] }
 0x174   : > { %823 = vmatmul.mubr.f32.gmra.mrb[10].mxu0 %v3629_v55  ;;  %936 = vmatmul.mubr.f32.gmra.mrb[10].mxu1 %v3629_v55  ;;  %v607_v53 = vld [vmem:[#allocation5 + $0x238] sm:$0xff]  ;;  %v678_v40 = vld [vmem:[#allocation5 + $0x470] sm:$0xff] }
 0x175   : > { %2618 = vmatpush1.bf16.msra.mxu0 %v2617_v1  ;;  %2650 = vmatpush1.bf16.msra.mxu1 %v2649_v2  ;;  %v2667_v1 = vpack.c.bf16 %v605_v7, %v593_v0  ;;  %v2699_v2 = vpack.c.bf16 %v607_v53, %v595_v52  ;;  %v691_v47 = vld [vmem:[#allocation5 + $0x4d8] sm:$0xff]  ;;  %v700_v0 = vld [vmem:[#allocation5 + $0x520] sm:$0xff]  ;;  %v690_v7 = vld [vmem:[#allocation5 + $0x4d0] sm:$0xff] }
 0x176   : > { %828 = vmatprep.mubr.f32.mxu0 %v3149_v61  ;;  %941 = vmatprep.mubr.f32.mxu1 %v3149_v61  ;;  %v703_v48 = vld [vmem:[#allocation5 + $0x538] sm:$0xff]  ;;  %v702_v52 = vld [vmem:[#allocation5 + $0x530] sm:$0xff] }
 0x177   : > { %2620 = vmatprep.subr.bf16.mxu0 %v2619_v8  ;;  %2652 = vmatprep.subr.bf16.mxu1 %v2651_v9  ;;  %v2669_v8 = vpack.c.bf16 %v604_v58, %v592_v57  ;;  %v2701_v9 = vpack.c.bf16 %v606_v60, %v594_v59  ;;  %v725_v57 = vld [vmem:[#allocation5 + $0x5e8] sm:$0xff]  ;;  %v715_v58 = vld [vmem:[#allocation5 + $0x598] sm:$0xff]  ;;  %v714_v3 = vld [vmem:[#allocation5 + $0x590] sm:$0xff] }
 0x178   : > { %829 = vmatmul.mubr.f32.gmra.mrb[12].mxu0 %v3637_v12  ;;  %942 = vmatmul.mubr.f32.gmra.mrb[12].mxu1 %v3637_v12  ;;  %v727_v59 = vld [vmem:[#allocation5 + $0x5f8] sm:$0xff] }
 0x179   : > { %2622 = vmatpush1.bf16.msra.mxu0 %v2621_v17  ;;  %2654 = vmatpush1.bf16.msra.mxu1 %v2653_v18  ;;  %v2703_v17 = vpack.c.bf16 %v631_v23, %v619_v4  ;;  %v641_v18 = vld [vmem:[#allocation5 + $0x348] sm:$0xff]  ;;  %v726_v4 = vld [vmem:[#allocation5 + $0x5f0] sm:$0xff] }
 0x17a   : > { %834 = vmatprep.mubr.f32.mxu0 %v3149_v61  ;;  %947 = vmatprep.mubr.f32.mxu1 %v3149_v61  ;;  %v2675_v31 = vpack.c.bf16 %v653_v19, %v641_v18  ;;  %v2721_v11 = vpack.c.bf16 %v726_v4, %v714_v3 }
 0x17b   : > { %2624 = vmatprep.subr.bf16.mxu0 %v2623_v24  ;;  %2656 = vmatprep.subr.bf16.mxu1 %v2655_v22  ;;  %v2705_v24 = vpack.c.bf16 %v630_v15, %v618_v14  ;;  %v640_v22 = vld [vmem:[#allocation5 + $0x340] sm:$0xff] }
 0x17c   : > { %835 = vmatmul.mubr.f32.gmra.mrb[14].mxu0 %v3645_v27  ;;  %948 = vmatmul.mubr.f32.gmra.mrb[14].mxu1 %v3645_v27  ;;  %v2677_v30 = vpack.c.bf16 %v652_v25, %v640_v22 }
 0x17d   : > { %2626 = vmatpush1.bf16.msra.mxu0 %v2625_v32  ;;  %2658 = vmatpush1.bf16.msra.mxu1 %v2657_v33  ;;  %v2707_v32 = vpack.c.bf16 %v655_v5, %v643_v20  ;;  %v665_v33 = vld [vmem:[#allocation5 + $0x408] sm:$0xff] }
 0x17e   : > { %1018 = vmatprep.mubr.f32.mxu0 %v3149_v61  ;;  %1131 = vmatprep.mubr.f32.mxu1 %v3149_v61  ;;  %v2679_v42 = vpack.c.bf16 %v677_v34, %v665_v33 }
 0x17f   : > { %2660 = vmatprep.subr.bf16.mxu0 %v2659_v37  ;;  %2692 = vmatprep.subr.bf16.mxu1 %v2691_v6  ;;  %v2709_v37 = vpack.c.bf16 %v654_v29, %v642_v28  ;;  %v664_v6 = vld [vmem:[#allocation5 + $0x400] sm:$0xff] }
 0x180   : > { %1019 = vmatmul.mubr.f32.vlgmr.msra.gmra.mrb[16].mxu0 %v3593_v43  ;;  %1132 = vmatmul.mubr.f32.vlgmr.msra.gmra.mrb[16].mxu1 %v3593_v43  ;;  %v2681_v49 = vpack.c.bf16 %v676_v38, %v664_v6 }
 0x181   : > { %2662 = vmatpush1.bf16.msra.mxu0 %v2661_v44  ;;  %2694 = vmatpush1.bf16.msra.mxu1 %v2693_v45  ;;  %v2711_v44 = vpack.c.bf16 %v679_v36, %v667_v35  ;;  %v689_v45 = vld [vmem:[#allocation5 + $0x4c8] sm:$0xff] }
 0x182   : > { %1024 = vmatprep.mubr.f32.mxu0 %v3149_v61  ;;  %1137 = vmatprep.mubr.f32.mxu1 %v3149_v61  ;;  %v2683_v53 = vpack.c.bf16 %v701_v46, %v689_v45 }
 0x183   : > { %2664 = vmatprep.subr.bf16.mxu0 %v2663_v50  ;;  %2696 = vmatprep.subr.bf16.mxu1 %v2695_v51  ;;  %v2713_v50 = vpack.c.bf16 %v678_v40, %v666_v39  ;;  %v688_v51 = vld [vmem:[#allocation5 + $0x4c0] sm:$0xff] }
 0x184   : > { %1025 = vmatmul.mubr.f32.gmra.mrb[18].mxu0 %v3600_v62  ;;  %1138 = vmatmul.mubr.f32.gmra.mrb[18].mxu1 %v3600_v62  ;;  %v2685_v60 = vpack.c.bf16 %v700_v0, %v688_v51 }
 0x185   : > { %2666 = vmatpush1.bf16.msra.mxu0 %v2665_v54  ;;  %2698 = vmatpush1.bf16.msra.mxu1 %v2697_v56  ;;  %v2715_v54 = vpack.c.bf16 %v703_v48, %v691_v47  ;;  %v713_v56 = vld [vmem:[#allocation5 + $0x588] sm:$0xff] }
 0x186   : > { %1030 = vmatprep.mubr.f32.mxu0 %v3149_v61  ;;  %1143 = vmatprep.mubr.f32.mxu1 %v3149_v61  ;;  %v2687_v23 = vpack.c.bf16 %v725_v57, %v713_v56 }
 0x187   : > { %2668 = vmatprep.subr.bf16.mxu0 %v2667_v1  ;;  %2700 = vmatprep.subr.bf16.mxu1 %v2699_v2  ;;  %v2717_v1 = vpack.c.bf16 %v702_v52, %v690_v7  ;;  %v712_v2 = vld [vmem:[#allocation5 + $0x580] sm:$0xff] }
 0x188   : > { %1031 = vmatmul.mubr.f32.gmra.mrb[20].mxu0 %v3605_v10  ;;  %1144 = vmatmul.mubr.f32.gmra.mrb[20].mxu1 %v3605_v10 }
 0x189   : > { %2670 = vmatpush1.bf16.msra.mxu0 %v2669_v8  ;;  %2702 = vmatpush1.bf16.msra.mxu1 %v2701_v9  ;;  %v2719_v8 = vpack.c.bf16 %v727_v59, %v715_v58  ;;  %v2689_v9 = vpack.c.bf16 %v724_v63, %v712_v2 }
 0x18a   : > { %1036 = vmatprep.mubr.f32.mxu0 %v3149_v61  ;;  %1149 = vmatprep.mubr.f32.mxu1 %v3149_v61 }
 0x18b   : > { %2672 = vmatprep.subr.bf16.mxu0 %v2671_v16  ;;  %2704 = vmatprep.subr.bf16.mxu1 %v2703_v17 }
 0x18c   : > { %1037 = vmatmul.mubr.f32.gmra.mrb[22].mxu0 %v3613_v26  ;;  %1150 = vmatmul.mubr.f32.gmra.mrb[22].mxu1 %v3613_v26 }
 0x18d   : > { %2674 = vmatpush1.bf16.msra.mxu0 %v2673_v21  ;;  %2706 = vmatpush1.bf16.msra.mxu1 %v2705_v24 }
 0x18e   : > { %1042 = vmatprep.mubr.f32.mxu0 %v3149_v61  ;;  %1155 = vmatprep.mubr.f32.mxu1 %v3149_v61 }
 0x18f   : > { %2676 = vmatprep.subr.bf16.mxu0 %v2675_v31  ;;  %2708 = vmatprep.subr.bf16.mxu1 %v2707_v32 }
 0x190   : > { %1043 = vmatmul.mubr.f32.gmra.mrb[24].mxu0 %v3621_v41  ;;  %1156 = vmatmul.mubr.f32.gmra.mrb[24].mxu1 %v3621_v41 }
 0x191   : > { %2678 = vmatpush1.bf16.msra.mxu0 %v2677_v30  ;;  %2710 = vmatpush1.bf16.msra.mxu1 %v2709_v37 }
 0x192   : > { %1048 = vmatprep.mubr.f32.mxu0 %v3149_v61  ;;  %1161 = vmatprep.mubr.f32.mxu1 %v3149_v61 }
 0x193   : > { %2680 = vmatprep.subr.bf16.mxu0 %v2679_v42  ;;  %2712 = vmatprep.subr.bf16.mxu1 %v2711_v44 }
 0x194   : > { %1049 = vmatmul.mubr.f32.gmra.mrb[26].mxu0 %v3629_v55  ;;  %1162 = vmatmul.mubr.f32.gmra.mrb[26].mxu1 %v3629_v55 }
 0x195   : > { %2682 = vmatpush1.bf16.msra.mxu0 %v2681_v49  ;;  %2714 = vmatpush1.bf16.msra.mxu1 %v2713_v50 }
 0x196   : > { %1054 = vmatprep.mubr.f32.mxu0 %v3149_v61  ;;  %1167 = vmatprep.mubr.f32.mxu1 %v3149_v61 }
 0x197   : > { %2684 = vmatprep.subr.bf16.mxu0 %v2683_v53  ;;  %2716 = vmatprep.subr.bf16.mxu1 %v2715_v54 }
 0x198   : > { %1055 = vmatmul.mubr.f32.gmra.mrb[28].mxu0 %v3637_v12  ;;  %1168 = vmatmul.mubr.f32.gmra.mrb[28].mxu1 %v3637_v12 }
 0x199   : > { %2686 = vmatpush1.bf16.msra.mxu0 %v2685_v60  ;;  %2718 = vmatpush1.bf16.msra.mxu1 %v2717_v1 }
 0x19a   : > { %1060 = vmatprep.mubr.f32.mxu0 %v3149_v61  ;;  %1173 = vmatprep.mubr.f32.mxu1 %v3149_v61 }
 0x19b   : > { %2688 = vmatprep.subr.bf16.mxu0 %v2687_v23  ;;  %2720 = vmatprep.subr.bf16.mxu1 %v2719_v8 }
 0x19c   : > { %1061 = vmatmul.mubr.f32.gmra.mrb[30].mxu0 %v3645_v27  ;;  %1174 = vmatmul.mubr.f32.gmra.mrb[30].mxu1 %v3645_v27 }
 0x19d   : > { %2690 = vmatpush1.bf16.msra.mxu0 %v2689_v9  ;;  %2722 = vmatpush1.bf16.msra.mxu1 %v2721_v11 }
 0x19e   : > { %1244 = vmatprep.mubr.f32.mxu0 %v3149_v61  ;;  %1357 = vmatprep.mubr.f32.mxu1 %v3149_v61 }
 0x1a0   : > { %1245 = vmatmul.mubr.f32.vlgmr.msra.gmra.mrb[32].mxu0 %v3593_v43  ;;  %1358 = vmatmul.mubr.f32.vlgmr.msra.gmra.mrb[32].mxu1 %v3593_v43 }
 0x1a1   : > { %1250 = vmatprep.mubr.f32.mxu0 %v3149_v61  ;;  %1363 = vmatprep.mubr.f32.mxu1 %v3149_v61 }
 0x1a4   : > { %1251 = vmatmul.mubr.f32.gmra.mrb[34].mxu0 %v3600_v62  ;;  %1364 = vmatmul.mubr.f32.gmra.mrb[34].mxu1 %v3600_v62 }
 0x1a5   : > { %1256 = vmatprep.mubr.f32.mxu0 %v3149_v61  ;;  %1369 = vmatprep.mubr.f32.mxu1 %v3149_v61 }
 0x1a8   : > { %1257 = vmatmul.mubr.f32.gmra.mrb[36].mxu0 %v3605_v10  ;;  %1370 = vmatmul.mubr.f32.gmra.mrb[36].mxu1 %v3605_v10 }
 0x1a9   : > { %1262 = vmatprep.mubr.f32.mxu0 %v3149_v61  ;;  %1375 = vmatprep.mubr.f32.mxu1 %v3149_v61 }
 0x1ac   : > { %1263 = vmatmul.mubr.f32.gmra.mrb[38].mxu0 %v3613_v26  ;;  %1376 = vmatmul.mubr.f32.gmra.mrb[38].mxu1 %v3613_v26 }
 0x1ad   : > { %1268 = vmatprep.mubr.f32.mxu0 %v3149_v61  ;;  %1381 = vmatprep.mubr.f32.mxu1 %v3149_v61 }
 0x1b0   : > { %1269 = vmatmul.mubr.f32.gmra.mrb[40].mxu0 %v3621_v41  ;;  %1382 = vmatmul.mubr.f32.gmra.mrb[40].mxu1 %v3621_v41 }
 0x1b1   : > { %1274 = vmatprep.mubr.f32.mxu0 %v3149_v61  ;;  %1387 = vmatprep.mubr.f32.mxu1 %v3149_v61 }
 0x1b4   : > { %1275 = vmatmul.mubr.f32.gmra.mrb[42].mxu0 %v3629_v55  ;;  %1388 = vmatmul.mubr.f32.gmra.mrb[42].mxu1 %v3629_v55 }
 0x1b5   : > { %1280 = vmatprep.mubr.f32.mxu0 %v3149_v61  ;;  %1393 = vmatprep.mubr.f32.mxu1 %v3149_v61 }
 0x1b8   : > { %1281 = vmatmul.mubr.f32.gmra.mrb[44].mxu0 %v3637_v12  ;;  %1394 = vmatmul.mubr.f32.gmra.mrb[44].mxu1 %v3637_v12 }
 0x1b9   : > { %1286 = vmatprep.mubr.f32.mxu0 %v3149_v61  ;;  %1399 = vmatprep.mubr.f32.mxu1 %v3149_v61 }
 0x1bc   : > { %1287 = vmatmul.mubr.f32.gmra.mrb[46].mxu0 %v3645_v27  ;;  %1400 = vmatmul.mubr.f32.gmra.mrb[46].mxu1 %v3645_v27 }
 0x233   : > { %v3720_v43 = vpop.f32.mrb[0].mxu0  ;;  %v907_v62 = vpop.f32.mrb[0].mxu1 }
 0x234   : > { %1570 = vst [vmem:[%s3723_s22] sm:$0xff] %v907_v62  ;;  %v3726_v10 = vpop.f32.mrb[1].mxu1  ;;  %1434 = vrot.lane.b32.xlu0 %v3720_v43, %s3150_s5  ;;  %v3730_v61 = vpop.f32.mrb[1].mxu0 }
 0x237   : > { %v3732_v26 = vpop.f32.mrb[2].mxu0  ;;  %v913_v41 = vpop.f32.mrb[2].mxu1 }
 0x238   : > { %1571 = vst [vmem:[%s3723_s22 + $0x8] sm:$0xff] %v913_v41  ;;  %1450 = vrot.lane.b32.xlu0 %v3720_v43, %s3151_s20  ;;  %v3737_v55 = vpop.f32.mrb[3].mxu1  ;;  %1436 = vrot.lane.b32.xlu1 %v3732_v26, %s3150_s5  ;;  %v3741_v12 = vpop.f32.mrb[3].mxu0 }
 0x23b   : > { %v3743_v27 = vpop.f32.mrb[4].mxu0  ;;  %v919_v13 = vpop.f32.mrb[4].mxu1 }
 0x23c   : > { %1498 = vrot.lane.b32.xlu0 %v3730_v61, %s3150_s5  ;;  %1452 = vrot.lane.b32.xlu1 %v3732_v26, %s3151_s20  ;;  %1572 = vst [vmem:[%s3723_s22 + $0x10] sm:$0xff] %v919_v13  ;;  %v3750_v14 = vpop.f32.mrb[5].mxu1  ;;  %v3752_v15 = vpop.f32.mrb[5].mxu0 }
 0x23f   : > { %v3754_v16 = vpop.f32.mrb[6].mxu0  ;;  %v925_v17 = vpop.f32.mrb[6].mxu1 }
 0x240   : > { %1514 = vrot.lane.b32.xlu0 %v3730_v61, %s3151_s20  ;;  %1500 = vrot.lane.b32.xlu1 %v3741_v12, %s3150_s5  ;;  %1573 = vst [vmem:[%s3723_s22 + $0x18] sm:$0xff] %v925_v17  ;;  %v3761_v18 = vpop.f32.mrb[7].mxu0  ;;  %v3763_v19 = vpop.f32.mrb[7].mxu1 }
 0x243   : > { %v3765_v20 = vpop.f32.mrb[8].mxu0  ;;  %v931_v5 = vpop.f32.mrb[8].mxu1 }
 0x244   : > { %1586 = vrot.lane.b32.xlu0 %v3726_v10, %s3150_s5  ;;  %1516 = vrot.lane.b32.xlu1 %v3741_v12, %s3151_s20  ;;  %1574 = vst [vmem:[%s3723_s22 + $0x20] sm:$0xff] %v931_v5  ;;  %v3772_v21 = vpop.f32.mrb[9].mxu0  ;;  %v3774_v24 = vpop.f32.mrb[9].mxu1 }
 0x247   : > { %v3776_v22 = vpop.f32.mrb[10].mxu0  ;;  %v937_v25 = vpop.f32.mrb[10].mxu1 }
 0x248   : > { %1602 = vrot.lane.b32.xlu0 %v3726_v10, %s3151_s20  ;;  %1588 = vrot.lane.b32.xlu1 %v3737_v55, %s3150_s5  ;;  %1575 = vst [vmem:[%s3723_s22 + $0x28] sm:$0xff] %v937_v25  ;;  %v3783_v28 = vpop.f32.mrb[11].mxu0  ;;  %v3785_v29 = vpop.f32.mrb[11].mxu1 }
 0x24b   : > { %v3787_v31 = vpop.f32.mrb[12].mxu0  ;;  %v943_v32 = vpop.f32.mrb[12].mxu1 }
 0x24c   : > { %1604 = vrot.lane.b32.xlu1 %v3737_v55, %s3151_s20  ;;  %1454 = vrot.lane.b32.xlu0 %v3743_v27, %s3151_s20  ;;  %1576 = vst [vmem:[%s3723_s22 + $0x30] sm:$0xff] %v943_v32  ;;  %v3794_v33 = vpop.f32.mrb[13].mxu0  ;;  %v3796_v34 = vpop.f32.mrb[13].mxu1 }
 0x24f   : > { %v3798_v35 = vpop.f32.mrb[14].mxu0  ;;  %v949_v36 = vpop.f32.mrb[14].mxu1 }
 0x250   : > { %1438 = vrot.lane.b32.xlu1 %v3743_v27, %s3150_s5  ;;  %1502 = vrot.lane.b32.xlu0 %v3752_v15, %s3150_s5  ;;  %1577 = vst [vmem:[%s3723_s22 + $0x38] sm:$0xff] %v949_v36  ;;  %v3805_v30 = vpop.f32.mrb[15].mxu0  ;;  %v3807_v37 = vpop.f32.mrb[15].mxu1 }
 0x253   : > { %v3809_v6 = vpop.f32.mrb[16].mxu0  ;;  %v3811_v38 = vpop.f32.mrb[16].mxu1 }
 0x254   : > { %4772 = vst [vmem:[#allocation31_spill] sm:$0xff] %v3811_v38  ;;  %1518 = vrot.lane.b32.xlu0 %v3752_v15, %s3151_s20  ;;  %1440 = vrot.lane.b32.xlu1 %v3754_v16, %s3150_s5  ;;  %v1022_v39 = vpop.f32.mrb[17].mxu0  ;;  %v3817_v40 = vpop.f32.mrb[17].mxu1 }
 0x255   : > { %4773 = vst [vmem:[#allocation32_spill] sm:$0xff] %v3817_v40  ;;  %2459 = vst [vmem:[%s3723_s22 + $0x40] sm:$0xff] %v1022_v39 }
 0x257   : > { %v3820_v42 = vpop.f32.mrb[18].mxu0  ;;  %v3822_v44 = vpop.f32.mrb[18].mxu1 }
 0x258   : > { %4774 = vst [vmem:[#allocation33_spill] sm:$0xff] %v3820_v42  ;;  %4775 = vst [vmem:[#allocation34_spill] sm:$0xff] %v3822_v44  ;;  %1590 = vrot.lane.b32.xlu0 %v3750_v14, %s3150_s5  ;;  %1456 = vrot.lane.b32.xlu1 %v3754_v16, %s3151_s20  ;;  %v1028_v45 = vpop.f32.mrb[19].mxu0  ;;  %v3828_v46 = vpop.f32.mrb[19].mxu1 }
 0x259   : > { %2460 = vst [vmem:[%s3723_s22 + $0x48] sm:$0xff] %v1028_v45 }
 0x25b   : > { %v3831_v47 = vpop.f32.mrb[20].mxu0  ;;  %v3833_v48 = vpop.f32.mrb[20].mxu1 }
 0x25c   : > { %1606 = vrot.lane.b32.xlu0 %v3750_v14, %s3151_s20  ;;  %1504 = vrot.lane.b32.xlu1 %v3761_v18, %s3150_s5  ;;  %v1034_v49 = vpop.f32.mrb[21].mxu0  ;;  %v3839_v50 = vpop.f32.mrb[21].mxu1 }
 0x25d   : > { %2461 = vst [vmem:[%s3723_s22 + $0x50] sm:$0xff] %v1034_v49 }
 0x25f   : > { %v3842_v51 = vpop.f32.mrb[22].mxu0  ;;  %v3844_v0 = vpop.f32.mrb[22].mxu1 }
 0x260   : > { %1520 = vrot.lane.b32.xlu1 %v3761_v18, %s3151_s20  ;;  %1442 = vrot.lane.b32.xlu0 %v3765_v20, %s3150_s5  ;;  %v1040_v7 = vpop.f32.mrb[23].mxu0  ;;  %v3850_v52 = vpop.f32.mrb[23].mxu1 }
 0x261   : > { %2462 = vst [vmem:[%s3723_s22 + $0x58] sm:$0xff] %v1040_v7 }
 0x263   : > { %v3853_v53 = vpop.f32.mrb[24].mxu0  ;;  %v3855_v54 = vpop.f32.mrb[24].mxu1 }
 0x264   : > { %1592 = vrot.lane.b32.xlu1 %v3763_v19, %s3150_s5  ;;  %1458 = vrot.lane.b32.xlu0 %v3765_v20, %s3151_s20  ;;  %v1046_v56 = vpop.f32.mrb[25].mxu0  ;;  %v3861_v57 = vpop.f32.mrb[25].mxu1 }
 0x265   : > { %2463 = vst [vmem:[%s3723_s22 + $0x60] sm:$0xff] %v1046_v56 }
 0x267   : > { %v3864_v58 = vpop.f32.mrb[26].mxu0  ;;  %v3866_v59 = vpop.f32.mrb[26].mxu1 }
 0x268   : > { %1608 = vrot.lane.b32.xlu1 %v3763_v19, %s3151_s20  ;;  %1506 = vrot.lane.b32.xlu0 %v3772_v21, %s3150_s5  ;;  %v1052_v60 = vpop.f32.mrb[27].mxu0  ;;  %v3872_v1 = vpop.f32.mrb[27].mxu1 }
 0x269   : > { %2464 = vst [vmem:[%s3723_s22 + $0x68] sm:$0xff] %v1052_v60 }
 0x26b   : > { %v3875_v2 = vpop.f32.mrb[28].mxu0  ;;  %v3877_v63 = vpop.f32.mrb[28].mxu1 }
 0x26c   : > { %1522 = vrot.lane.b32.xlu0 %v3772_v21, %s3151_s20  ;;  %1444 = vrot.lane.b32.xlu1 %v3776_v22, %s3150_s5  ;;  %v1058_v3 = vpop.f32.mrb[29].mxu0  ;;  %v3883_v4 = vpop.f32.mrb[29].mxu1 }
 0x26d   : > { %2465 = vst [vmem:[%s3723_s22 + $0x70] sm:$0xff] %v1058_v3 }
 0x26f   : > { %v3886_v23 = vpop.f32.mrb[30].mxu0  ;;  %v3888_v8 = vpop.f32.mrb[30].mxu1 }
 0x270   : > { %1594 = vrot.lane.b32.xlu0 %v3774_v24, %s3150_s5  ;;  %1460 = vrot.lane.b32.xlu1 %v3776_v22, %s3151_s20  ;;  %v1064_v9 = vpop.f32.mrb[31].mxu0  ;;  %v3894_v11 = vpop.f32.mrb[31].mxu1 }
 0x271   : > { %2466 = vst [vmem:[%s3723_s22 + $0x78] sm:$0xff] %v1064_v9 }
 0x273   : > { %v1246_v62 = vpop.f32.mrb[32].mxu0  ;;  %v3897_v41 = vpop.f32.mrb[32].mxu1 }
 0x274   : > { %2483 = vst [vmem:[%s3723_s22 + $0x80] sm:$0xff] %v1246_v62  ;;  %1610 = vrot.lane.b32.xlu0 %v3774_v24, %s3151_s20  ;;  %1508 = vrot.lane.b32.xlu1 %v3783_v28, %s3150_s5  ;;  %v3904_v13 = vpop.f32.mrb[33].mxu0  ;;  %v1361_v17 = vpop.f32.mrb[33].mxu1 }
 0x275   : > { %2507 = vst [vmem:[%s3723_s22 + $0xc0] sm:$0xff] %v1361_v17 }
 0x277   : > { %v1252_v5 = vpop.f32.mrb[34].mxu0  ;;  %v3907_v25 = vpop.f32.mrb[34].mxu1 }
 0x278   : > { %2484 = vst [vmem:[%s3723_s22 + $0x88] sm:$0xff] %v1252_v5  ;;  %1524 = vrot.lane.b32.xlu1 %v3783_v28, %s3151_s20  ;;  %v1367_v32 = vpop.f32.mrb[35].mxu1  ;;  %1446 = vrot.lane.b32.xlu0 %v3787_v31, %s3150_s5  ;;  %v3914_v36 = vpop.f32.mrb[35].mxu0 }
 0x279   : > { %2508 = vst [vmem:[%s3723_s22 + $0xc8] sm:$0xff] %v1367_v32 }
 0x27b   : > { %v1258_v39 = vpop.f32.mrb[36].mxu0  ;;  %v3917_v45 = vpop.f32.mrb[36].mxu1 }
 0x27c   : > { %2485 = vst [vmem:[%s3723_s22 + $0x90] sm:$0xff] %v1258_v39  ;;  %1596 = vrot.lane.b32.xlu1 %v3785_v29, %s3150_s5  ;;  %v1373_v49 = vpop.f32.mrb[37].mxu1  ;;  %1462 = vrot.lane.b32.xlu0 %v3787_v31, %s3151_s20  ;;  %v3924_v7 = vpop.f32.mrb[37].mxu0 }
 0x27d   : > { %2509 = vst [vmem:[%s3723_s22 + $0xd0] sm:$0xff] %v1373_v49 }
 0x27f   : > { %v1264_v56 = vpop.f32.mrb[38].mxu0  ;;  %v3927_v60 = vpop.f32.mrb[38].mxu1 }
 0x280   : > { %4776 = vst [vmem:[#allocation35_spill] sm:$0xff] %v3927_v60  ;;  %2486 = vst [vmem:[%s3723_s22 + $0x98] sm:$0xff] %v1264_v56  ;;  %1612 = vrot.lane.b32.xlu1 %v3785_v29, %s3151_s20  ;;  %v1379_v3 = vpop.f32.mrb[39].mxu1  ;;  %1510 = vrot.lane.b32.xlu0 %v3794_v33, %s3150_s5  ;;  %v3934_v9 = vpop.f32.mrb[39].mxu0 }
 0x281   : > { %4777 = vst [vmem:[#allocation36_spill] sm:$0xff] %v3934_v9  ;;  %2510 = vst [vmem:[%s3723_s22 + $0xd8] sm:$0xff] %v1379_v3 }
 0x283   : > { %v1270_v62 = vpop.f32.mrb[40].mxu0  ;;  %v3937_v17 = vpop.f32.mrb[40].mxu1 }
 0x284   : > { %4778 = vst [vmem:[#allocation37_spill] sm:$0xff] %v3937_v17  ;;  %2487 = vst [vmem:[%s3723_s22 + $0xa0] sm:$0xff] %v1270_v62  ;;  %v1385_v5 = vpop.f32.mrb[41].mxu1  ;;  %1526 = vrot.lane.b32.xlu0 %v3794_v33, %s3151_s20  ;;  %1448 = vrot.lane.b32.xlu1 %v3798_v35, %s3150_s5  ;;  %v3944_v32 = vpop.f32.mrb[41].mxu0 }
 0x285   : > { %4779 = vst [vmem:[#allocation38_spill] sm:$0xff] %v3944_v32  ;;  %2511 = vst [vmem:[%s3723_s22 + $0xe0] sm:$0xff] %v1385_v5 }
 0x287   : > { %v1276_v39 = vpop.f32.mrb[42].mxu0  ;;  %v3947_v49 = vpop.f32.mrb[42].mxu1 }
 0x288   : > { %4780 = vst [vmem:[#allocation39_spill] sm:$0xff] %v3947_v49  ;;  %2488 = vst [vmem:[%s3723_s22 + $0xa8] sm:$0xff] %v1276_v39  ;;  %v1391_v56 = vpop.f32.mrb[43].mxu1  ;;  %1598 = vrot.lane.b32.xlu0 %v3796_v34, %s3150_s5  ;;  %1464 = vrot.lane.b32.xlu1 %v3798_v35, %s3151_s20  ;;  %v3954_v3 = vpop.f32.mrb[43].mxu0 }
 0x289   : > { %4781 = vst [vmem:[#allocation40_spill] sm:$0xff] %v3954_v3  ;;  %2512 = vst [vmem:[%s3723_s22 + $0xe8] sm:$0xff] %v1391_v56 }
 0x28b   : > { %v1282_v62 = vpop.f32.mrb[44].mxu0  ;;  %v3957_v32 = vpop.f32.mrb[44].mxu1 }
 0x28c   : > { %4782 = vst [vmem:[#allocation41_spill] sm:$0xff] %v3957_v32  ;;  %2489 = vst [vmem:[%s3723_s22 + $0xb0] sm:$0xff] %v1282_v62  ;;  %v1397_v5 = vpop.f32.mrb[45].mxu1  ;;  %1614 = vrot.lane.b32.xlu0 %v3796_v34, %s3151_s20  ;;  %1512 = vrot.lane.b32.xlu1 %v3805_v30, %s3150_s5  ;;  %v3964_v39 = vpop.f32.mrb[45].mxu0 }
 0x28d   : > { %4783 = vst [vmem:[#allocation42_spill] sm:$0xff] %v3964_v39  ;;  %2513 = vst [vmem:[%s3723_s22 + $0xf0] sm:$0xff] %v1397_v5  ;;  %v4012_v39 = vld [vmem:[%s4009_s3] sm:$0xff] }
 0x28f   : > { %v1288_v49 = vpop.f32.mrb[46].mxu0  ;;  %v3967_v9 = vpop.f32.mrb[46].mxu1 }
 0x290   : > { %4784 = vst [vmem:[#allocation43_spill] sm:$0xff] %v3967_v9  ;;  %2490 = vst [vmem:[%s3723_s22 + $0xb8] sm:$0xff] %v1288_v49  ;;  %v1403_v56 = vpop.f32.mrb[47].mxu1  ;;  %1528 = vrot.lane.b32.xlu1 %v3805_v30, %s3151_s20  ;;  %1650 = vrot.lane.b32.xlu0 %v3809_v6, %s3150_s5  ;;  %v3974_v62 = vpop.f32.mrb[47].mxu0  ;;  %v1422_v49 = vlaneseq }
 0x291   : > { %4785 = vst [vmem:[#allocation44_spill] sm:$0xff] %v3974_v62  ;;  %2514 = vst [vmem:[%s3723_s22 + $0xf8] sm:$0xff] %v1403_v56 }
 0x292   : > { %v1423_v5 = vand.u32 127, %v1422_v49  ;;  %v4006_v49 = vld [vmem:[%s3538_s1] sm:$0xff] }
 0x294   : > { %1600 = vrot.lane.b32.xlu1 %v3807_v37, %s3150_s5  ;;  %1666 = vrot.lane.b32.xlu0 %v3809_v6, %s3151_s20  ;;  %v1424_v56 = vand.u32 32, %v1423_v5 }
 0x296   : > { %vm4001_vm0 = vcmp.eq.s32.totalorder %v1424_v56, 0  ;;  %v1426_v56 = vmul.f32 %v4006_v49, %v3720_v43 }
 0x298   : > { %1616 = vrot.lane.b32.xlu1 %v3807_v37, %s3151_s20  ;;  %1741 = vrot.lane.b32.xlu0 %v3811_v38, %s3150_s5 }
 0x29c   : > { %1757 = vrot.lane.b32.xlu0 %v3811_v38, %s3151_s20  ;;  %1652 = vrot.lane.b32.xlu1 %v3820_v42, %s3150_s5 }
 0x2a0   : > { %1805 = vrot.lane.b32.xlu0 %v3817_v40, %s3150_s5  ;;  %1668 = vrot.lane.b32.xlu1 %v3820_v42, %s3151_s20  ;;  %v4027_v42 = vld [vmem:[%s4009_s3 + $0x8] sm:$0xff] }
 0x2a4   : > { %1821 = vrot.lane.b32.xlu0 %v3817_v40, %s3151_s20  ;;  %1743 = vrot.lane.b32.xlu1 %v3822_v44, %s3150_s5  ;;  %v4024_v40 = vld [vmem:[%s3538_s1 + $0x8] sm:$0xff] }
 0x2a5   : > { %v1427_v43 = vmul.f32 %v4024_v40, %v3732_v26 }
 0x2a6   : > { %v1435_v62 = vpop.permute.xlu0 %1434 }
 0x2a8   : > { %1759 = vrot.lane.b32.xlu1 %v3822_v44, %s3151_s20  ;;  %1654 = vrot.lane.b32.xlu0 %v3831_v47, %s3150_s5 }
 0x2aa   : > { %v1437_v5 = vpop.permute.xlu1 %1436  ;;  %v1451_v3 = vpop.permute.xlu0 %1450 }
 0x2ab   : > { %v1466_v32 = vsel %vm4001_vm0, %v1451_v3, %v1435_v62 }
 0x2ac   : > { %v1474_v44 = vmul.f32 %v1466_v32, %v4012_v39  ;;  %1807 = vrot.lane.b32.xlu1 %v3828_v46, %s3150_s5  ;;  %1670 = vrot.lane.b32.xlu0 %v3831_v47, %s3151_s20 }
 0x2ae   : > { %v1482_v17 = vadd.f32 %v1474_v44, %v1426_v56  ;;  %v1453_v38 = vpop.permute.xlu1 %1452  ;;  %v1499_v60 = vpop.permute.xlu0 %1498 }
 0x2af   : > { %v1467_v3 = vsel %vm4001_vm0, %v1453_v38, %v1437_v5  ;;  %v1490_v5 = vmul.f32 %v4006_v49, %v3730_v61 }
 0x2b0   : > { %1554 = vst [vmem:[%s4034_s29] sm:$0xff] %v1482_v17  ;;  %v1475_v32 = vmul.f32 %v1467_v3, %v4027_v42  ;;  %1823 = vrot.lane.b32.xlu1 %v3828_v46, %s3151_s20  ;;  %1745 = vrot.lane.b32.xlu0 %v3833_v48, %s3150_s5 }
 0x2b2   : > { %v1483_v44 = vadd.f32 %v1475_v32, %v1427_v43  ;;  %v1501_v62 = vpop.permute.xlu1 %1500  ;;  %v1515_v38 = vpop.permute.xlu0 %1514 }
 0x2b3   : > { %v1530_v26 = vsel %vm4001_vm0, %v1515_v38, %v1499_v60  ;;  %v1491_v60 = vmul.f32 %v4024_v40, %v3741_v12 }
 0x2b4   : > { %1555 = vst [vmem:[%s4034_s29 + $0x8] sm:$0xff] %v1483_v44  ;;  %v1538_v17 = vmul.f32 %v1530_v26, %v4012_v39  ;;  %1761 = vrot.lane.b32.xlu0 %v3833_v48, %s3151_s20  ;;  %1656 = vrot.lane.b32.xlu1 %v3842_v51, %s3150_s5  ;;  %v1578_v26 = vmul.f32 %v4006_v49, %v3726_v10 }
 0x2b6   : > { %v1546_v56 = vadd.f32 %v1538_v17, %v1490_v5  ;;  %v1517_v3 = vpop.permute.xlu1 %1516  ;;  %v1587_v43 = vpop.permute.xlu0 %1586 }
 0x2b7   : > { %v1531_v32 = vsel %vm4001_vm0, %v1517_v3, %v1501_v62 }
 0x2b8   : > { %1562 = vst [vmem:[%s4057_s10] sm:$0xff] %v1546_v56  ;;  %v1539_v61 = vmul.f32 %v1531_v32, %v4027_v42  ;;  %1809 = vrot.lane.b32.xlu0 %v3839_v50, %s3150_s5  ;;  %1672 = vrot.lane.b32.xlu1 %v3842_v51, %s3151_s20  ;;  %v1579_v32 = vmul.f32 %v4024_v40, %v3737_v55 }
 0x2ba   : > { %v1547_v44 = vadd.f32 %v1539_v61, %v1491_v60  ;;  %v1589_v38 = vpop.permute.xlu1 %1588  ;;  %v1603_v62 = vpop.permute.xlu0 %1602  ;;  %v4086_v60 = vld [vmem:[%s3538_s1 + $0x10] sm:$0xff] }
 0x2bb   : > { %v1618_v12 = vsel %vm4001_vm0, %v1603_v62, %v1587_v43  ;;  %v4089_v61 = vld [vmem:[%s4009_s3 + $0x10] sm:$0xff] }
 0x2bc   : > { %1563 = vst [vmem:[%s4057_s10 + $0x8] sm:$0xff] %v1547_v44  ;;  %v1626_v5 = vmul.f32 %v1618_v12, %v4012_v39  ;;  %1825 = vrot.lane.b32.xlu0 %v3839_v50, %s3151_s20  ;;  %1747 = vrot.lane.b32.xlu1 %v3844_v0, %s3150_s5  ;;  %v1428_v12 = vmul.f32 %v4086_v60, %v3743_v27 }
 0x2be   : > { %v1634_v17 = vadd.f32 %v1626_v5, %v1578_v26  ;;  %v1605_v56 = vpop.permute.xlu1 %1604  ;;  %v1455_v3 = vpop.permute.xlu0 %1454 }
 0x2bf   : > { %v1619_v43 = vsel %vm4001_vm0, %v1605_v56, %v1589_v38 }
 0x2c0   : > { %2443 = vst [vmem:[%s4034_s29 + $0x40] sm:$0xff] %v1634_v17  ;;  %v1627_v10 = vmul.f32 %v1619_v43, %v4027_v42  ;;  %1763 = vrot.lane.b32.xlu1 %v3844_v0, %s3151_s20  ;;  %1658 = vrot.lane.b32.xlu0 %v3853_v53, %s3150_s5  ;;  %v1492_v43 = vmul.f32 %v4086_v60, %v3752_v15 }
 0x2c2   : > { %v1635_v44 = vadd.f32 %v1627_v10, %v1579_v32  ;;  %v1439_v62 = vpop.permute.xlu1 %1438  ;;  %v1503_v38 = vpop.permute.xlu0 %1502  ;;  %v4112_v32 = vld [vmem:[%s3538_s1 + $0x18] sm:$0xff] }
 0x2c3   : > { %v1468_v55 = vsel %vm4001_vm0, %v1455_v3, %v1439_v62  ;;  %v4115_v10 = vld [vmem:[%s4009_s3 + $0x18] sm:$0xff] }
 0x2c4   : > { %2444 = vst [vmem:[%s4034_s29 + $0x48] sm:$0xff] %v1635_v44  ;;  %v1476_v26 = vmul.f32 %v1468_v55, %v4089_v61  ;;  %1811 = vrot.lane.b32.xlu1 %v3850_v52, %s3150_s5  ;;  %1674 = vrot.lane.b32.xlu0 %v3853_v53, %s3151_s20  ;;  %v1429_v55 = vmul.f32 %v4112_v32, %v3754_v16 }
 0x2c5   : > { %v1580_v16 = vmul.f32 %v4086_v60, %v3750_v14 }
 0x2c6   : > { %v1484_v5 = vadd.f32 %v1476_v26, %v1428_v12  ;;  %v1441_v17 = vpop.permute.xlu1 %1440  ;;  %v1519_v56 = vpop.permute.xlu0 %1518 }
 0x2c7   : > { %v1532_v3 = vsel %vm4001_vm0, %v1519_v56, %v1503_v38 }
 0x2c8   : > { %1556 = vst [vmem:[%s4034_s29 + $0x10] sm:$0xff] %v1484_v5  ;;  %v1540_v27 = vmul.f32 %v1532_v3, %v4089_v61  ;;  %1827 = vrot.lane.b32.xlu1 %v3850_v52, %s3151_s20  ;;  %1749 = vrot.lane.b32.xlu0 %v3855_v54, %s3150_s5 }
 0x2ca   : > { %v1548_v44 = vadd.f32 %v1540_v27, %v1492_v43  ;;  %v1457_v62 = vpop.permute.xlu1 %1456  ;;  %v1591_v38 = vpop.permute.xlu0 %1590 }
 0x2cb   : > { %v1469_v15 = vsel %vm4001_vm0, %v1457_v62, %v1441_v17 }
 0x2cc   : > { %1564 = vst [vmem:[%s4057_s10 + $0x10] sm:$0xff] %v1548_v44  ;;  %v1477_v12 = vmul.f32 %v1469_v15, %v4115_v10  ;;  %1765 = vrot.lane.b32.xlu0 %v3855_v54, %s3151_s20  ;;  %1660 = vrot.lane.b32.xlu1 %v3864_v58, %s3150_s5  ;;  %v4148_v15 = vld [vmem:[%s3538_s1 + $0x20] sm:$0xff] }
 0x2ce   : > { %v1485_v26 = vadd.f32 %v1477_v12, %v1429_v55  ;;  %v1505_v5 = vpop.permute.xlu1 %1504  ;;  %v1607_v56 = vpop.permute.xlu0 %1606  ;;  %v4151_v55 = vld [vmem:[%s4009_s3 + $0x20] sm:$0xff] }
 0x2cf   : > { %v1620_v17 = vsel %vm4001_vm0, %v1607_v56, %v1591_v38  ;;  %v1493_v38 = vmul.f32 %v4112_v32, %v3761_v18  ;;  %v1430_v56 = vmul.f32 %v4148_v15, %v3765_v20  ;;  %v1581_v20 = vmul.f32 %v4112_v32, %v3763_v19 }
 0x2d0   : > { %1557 = vst [vmem:[%s4034_s29 + $0x18] sm:$0xff] %v1485_v26  ;;  %v1628_v3 = vmul.f32 %v1620_v17, %v4089_v61  ;;  %1813 = vrot.lane.b32.xlu0 %v3861_v57, %s3150_s5  ;;  %1676 = vrot.lane.b32.xlu1 %v3864_v58, %s3151_s20 }
 0x2d2   : > { %v1636_v43 = vadd.f32 %v1628_v3, %v1580_v16  ;;  %v1521_v27 = vpop.permute.xlu1 %1520  ;;  %v1443_v44 = vpop.permute.xlu0 %1442 }
 0x2d3   : > { %v1533_v62 = vsel %vm4001_vm0, %v1521_v27, %v1505_v5 }
 0x2d4   : > { %2445 = vst [vmem:[%s4034_s29 + $0x50] sm:$0xff] %v1636_v43  ;;  %v1541_v14 = vmul.f32 %v1533_v62, %v4115_v10  ;;  %1829 = vrot.lane.b32.xlu0 %v3861_v57, %s3151_s20  ;;  %1751 = vrot.lane.b32.xlu1 %v3866_v59, %s3150_s5 }
 0x2d6   : > { %v1549_v12 = vadd.f32 %v1541_v14, %v1493_v38  ;;  %v1593_v26 = vpop.permute.xlu1 %1592  ;;  %v1459_v5 = vpop.permute.xlu0 %1458 }
 0x2d7   : > { %v1470_v18 = vsel %vm4001_vm0, %v1459_v5, %v1443_v44  ;;  %v4184_v5 = vld [vmem:[%s3538_s1 + $0x28] sm:$0xff] }
 0x2d8   : > { %1565 = vst [vmem:[%s4057_s10 + $0x18] sm:$0xff] %v1549_v12  ;;  %v1478_v17 = vmul.f32 %v1470_v18, %v4151_v55  ;;  %1767 = vrot.lane.b32.xlu1 %v3866_v59, %s3151_s20  ;;  %1662 = vrot.lane.b32.xlu0 %v3875_v2, %s3150_s5  ;;  %v4187_v18 = vld [vmem:[%s4009_s3 + $0x28] sm:$0xff] }
 0x2da   : > { %v1486_v16 = vadd.f32 %v1478_v17, %v1430_v56  ;;  %v1609_v3 = vpop.permute.xlu1 %1608  ;;  %v1507_v43 = vpop.permute.xlu0 %1506 }
 0x2db   : > { %v1621_v27 = vsel %vm4001_vm0, %v1609_v3, %v1593_v26  ;;  %v1494_v26 = vmul.f32 %v4148_v15, %v3772_v21  ;;  %v1431_v3 = vmul.f32 %v4184_v5, %v3776_v22  ;;  %v1582_v22 = vmul.f32 %v4148_v15, %v3774_v24 }
 0x2dc   : > { %1558 = vst [vmem:[%s4034_s29 + $0x20] sm:$0xff] %v1486_v16  ;;  %v1629_v44 = vmul.f32 %v1621_v27, %v4115_v10  ;;  %1815 = vrot.lane.b32.xlu1 %v3872_v1, %s3150_s5  ;;  %1678 = vrot.lane.b32.xlu0 %v3875_v2, %s3151_s20 }
 0x2de   : > { %v1637_v62 = vadd.f32 %v1629_v44, %v1581_v20  ;;  %v1445_v38 = vpop.permute.xlu1 %1444  ;;  %v1523_v14 = vpop.permute.xlu0 %1522 }
 0x2df   : > { %v1534_v12 = vsel %vm4001_vm0, %v1523_v14, %v1507_v43 }
 0x2e0   : > { %2446 = vst [vmem:[%s4034_s29 + $0x58] sm:$0xff] %v1637_v62  ;;  %v1542_v19 = vmul.f32 %v1534_v12, %v4151_v55  ;;  %1831 = vrot.lane.b32.xlu1 %v3872_v1, %s3151_s20  ;;  %1753 = vrot.lane.b32.xlu0 %v3877_v63, %s3150_s5 }
 0x2e2   : > { %v1550_v56 = vadd.f32 %v1542_v19, %v1494_v26  ;;  %v1461_v17 = vpop.permute.xlu1 %1460  ;;  %v1595_v16 = vpop.permute.xlu0 %1594 }
 0x2e3   : > { %v1471_v21 = vsel %vm4001_vm0, %v1461_v17, %v1445_v38  ;;  %v4220_v17 = vld [vmem:[%s3538_s1 + $0x30] sm:$0xff] }
 0x2e4   : > { %1566 = vst [vmem:[%s4057_s10 + $0x20] sm:$0xff] %v1550_v56  ;;  %v1479_v43 = vmul.f32 %v1471_v21, %v4187_v18  ;;  %1769 = vrot.lane.b32.xlu0 %v3877_v63, %s3151_s20  ;;  %1664 = vrot.lane.b32.xlu1 %v3886_v23, %s3150_s5  ;;  %v1495_v56 = vmul.f32 %v4184_v5, %v3783_v28 }
 0x2e6   : > { %v1487_v27 = vadd.f32 %v1479_v43, %v1431_v3  ;;  %v1509_v20 = vpop.permute.xlu1 %1508  ;;  %v1611_v44 = vpop.permute.xlu0 %1610 }
 0x2e7   : > { %v1622_v62 = vsel %vm4001_vm0, %v1611_v44, %v1595_v16  ;;  %v4223_v16 = vld [vmem:[%s4009_s3 + $0x30] sm:$0xff] }
 0x2e8   : > { %1559 = vst [vmem:[%s4034_s29 + $0x28] sm:$0xff] %v1487_v27  ;;  %v1630_v38 = vmul.f32 %v1622_v62, %v4151_v55  ;;  %1817 = vrot.lane.b32.xlu0 %v3883_v4, %s3150_s5  ;;  %1680 = vrot.lane.b32.xlu1 %v3886_v23, %s3151_s20  ;;  %v1432_v27 = vmul.f32 %v4220_v17, %v3787_v31 }
 0x2e9   : > { %v1583_v31 = vmul.f32 %v4184_v5, %v3785_v29 }
 0x2ea   : > { %v1638_v14 = vadd.f32 %v1630_v38, %v1582_v22  ;;  %v1525_v12 = vpop.permute.xlu1 %1524  ;;  %v1447_v26 = vpop.permute.xlu0 %1446 }
 0x2eb   : > { %v1535_v19 = vsel %vm4001_vm0, %v1525_v12, %v1509_v20 }
 0x2ec   : > { %2447 = vst [vmem:[%s4034_s29 + $0x60] sm:$0xff] %v1638_v14  ;;  %v1543_v24 = vmul.f32 %v1535_v19, %v4187_v18  ;;  %1833 = vrot.lane.b32.xlu0 %v3883_v4, %s3151_s20  ;;  %1755 = vrot.lane.b32.xlu1 %v3888_v8, %s3150_s5 }
 0x2ee   : > { %v1551_v21 = vadd.f32 %v1543_v24, %v1495_v56  ;;  %v1597_v3 = vpop.permute.xlu1 %1596  ;;  %v1463_v43 = vpop.permute.xlu0 %1462  ;;  %v1496_v24 = vmul.f32 %v4220_v17, %v3794_v33 }
 0x2ef   : > { %v1472_v28 = vsel %vm4001_vm0, %v1463_v43, %v1447_v26 }
 0x2f0   : > { %1567 = vst [vmem:[%s4057_s10 + $0x28] sm:$0xff] %v1551_v21  ;;  %v1480_v20 = vmul.f32 %v1472_v28, %v4223_v16  ;;  %1960 = vrot.lane.b32.xlu0 %v3897_v41, %s3150_s5  ;;  %1771 = vrot.lane.b32.xlu1 %v3888_v8, %s3151_s20  ;;  %v4256_v21 = vld [vmem:[%s3538_s1 + $0x38] sm:$0xff] }
 0x2f2   : > { %v1488_v44 = vadd.f32 %v1480_v20, %v1432_v27  ;;  %v1613_v62 = vpop.permute.xlu1 %1612  ;;  %v1511_v22 = vpop.permute.xlu0 %1510  ;;  %v1433_v20 = vmul.f32 %v4256_v21, %v3798_v35 }
 0x2f3   : > { %v1623_v38 = vsel %vm4001_vm0, %v1613_v62, %v1597_v3  ;;  %v4259_v3 = vld [vmem:[%s4009_s3 + $0x38] sm:$0xff] }
 0x2f4   : > { %1560 = vst [vmem:[%s4034_s29 + $0x30] sm:$0xff] %v1488_v44  ;;  %v1631_v14 = vmul.f32 %v1623_v38, %v4187_v18  ;;  %1976 = vrot.lane.b32.xlu0 %v3897_v41, %s3151_s20  ;;  %1819 = vrot.lane.b32.xlu1 %v3894_v11, %s3150_s5 }
 0x2f6   : > { %v1639_v12 = vadd.f32 %v1631_v14, %v1583_v31  ;;  %v1449_v26 = vpop.permute.xlu1 %1448  ;;  %v1527_v19 = vpop.permute.xlu0 %1526  ;;  %v1584_v14 = vmul.f32 %v4220_v17, %v3796_v34 }
 0x2f7   : > { %v1536_v56 = vsel %vm4001_vm0, %v1527_v19, %v1511_v22 }
 0x2f8   : > { %2448 = vst [vmem:[%s4034_s29 + $0x68] sm:$0xff] %v1639_v12  ;;  %v1544_v29 = vmul.f32 %v1536_v56, %v4223_v16  ;;  %1835 = vrot.lane.b32.xlu1 %v3894_v11, %s3151_s20  ;;  %1896 = vrot.lane.b32.xlu0 %v3904_v13, %s3150_s5 }
 0x2fa   : > { %v1552_v43 = vadd.f32 %v1544_v29, %v1496_v24  ;;  %v1465_v28 = vpop.permute.xlu1 %1464  ;;  %v1599_v27 = vpop.permute.xlu0 %1598  ;;  %v1497_v24 = vmul.f32 %v4256_v21, %v3805_v30 }
 0x2fb   : > { %v1473_v33 = vsel %vm4001_vm0, %v1465_v28, %v1449_v26 }
 0x2fc   : > { %1568 = vst [vmem:[%s4057_s10 + $0x30] sm:$0xff] %v1552_v43  ;;  %v1481_v44 = vmul.f32 %v1473_v33, %v4259_v3  ;;  %1962 = vrot.lane.b32.xlu1 %v3907_v25, %s3150_s5  ;;  %1912 = vrot.lane.b32.xlu0 %v3904_v13, %s3151_s20  ;;  %v1642_v33 = vmul.f32 %v4006_v49, %v3809_v6 }
 0x2fe   : > { %v1489_v62 = vadd.f32 %v1481_v44, %v1433_v20  ;;  %v1513_v22 = vpop.permute.xlu1 %1512  ;;  %v1615_v38 = vpop.permute.xlu0 %1614 }
 0x2ff   : > { %v1624_v31 = vsel %vm4001_vm0, %v1615_v38, %v1599_v27  ;;  %v1585_v38 = vmul.f32 %v4256_v21, %v3807_v37 }
 0x300   : > { %1561 = vst [vmem:[%s4034_s29 + $0x38] sm:$0xff] %v1489_v62  ;;  %v1632_v35 = vmul.f32 %v1624_v31, %v4223_v16  ;;  %1978 = vrot.lane.b32.xlu1 %v3907_v25, %s3151_s20  ;;  %1964 = vrot.lane.b32.xlu0 %v3917_v45, %s3150_s5  ;;  %v4788_v31 = vld [vmem:[#allocation35_spill] sm:$0xff] }
 0x302   : > { %v1640_v12 = vadd.f32 %v1632_v35, %v1584_v14  ;;  %v1529_v26 = vpop.permute.xlu1 %1528  ;;  %v1651_v19 = vpop.permute.xlu0 %1650 }
 0x303   : > { %v1537_v56 = vsel %vm4001_vm0, %v1529_v26, %v1513_v22 }
 0x304   : > { %2449 = vst [vmem:[%s4034_s29 + $0x70] sm:$0xff] %v1640_v12  ;;  %v1545_v34 = vmul.f32 %v1537_v56, %v4259_v3  ;;  %1898 = vrot.lane.b32.xlu1 %v3914_v36, %s3150_s5  ;;  %1980 = vrot.lane.b32.xlu0 %v3917_v45, %s3151_s20 }
 0x306   : > { %v1553_v29 = vadd.f32 %v1545_v34, %v1497_v24  ;;  %v1601_v43 = vpop.permute.xlu1 %1600  ;;  %v1667_v28 = vpop.permute.xlu0 %1666  ;;  %v4790_v24 = vld [vmem:[#allocation37_spill] sm:$0xff] }
 0x307   : > { %v1682_v27 = vsel %vm4001_vm0, %v1667_v28, %v1651_v19  ;;  %v4789_v19 = vld [vmem:[#allocation31_spill] sm:$0xff] }
 0x308   : > { %1569 = vst [vmem:[%s4057_s10 + $0x38] sm:$0xff] %v1553_v29  ;;  %v1690_v30 = vmul.f32 %v1682_v27, %v4012_v39  ;;  %1914 = vrot.lane.b32.xlu1 %v3914_v36, %s3151_s20  ;;  %1900 = vrot.lane.b32.xlu0 %v3924_v7, %s3150_s5  ;;  %v1733_v56 = vmul.f32 %v4006_v49, %v4789_v19  ;;  %v4791_v27 = vld [vmem:[#allocation33_spill] sm:$0xff] }
 0x30a   : > { %v1698_v20 = vadd.f32 %v1690_v30, %v1642_v33  ;;  %v1617_v44 = vpop.permute.xlu1 %1616  ;;  %v1742_v62 = vpop.permute.xlu0 %1741  ;;  %v1643_v33 = vmul.f32 %v4024_v40, %v4791_v27 }
 0x30b   : > { %v1625_v22 = vsel %vm4001_vm0, %v1617_v44, %v1601_v43 }
 0x30c   : > { %2451 = vst [vmem:[%s4057_s10 + $0x40] sm:$0xff] %v1698_v20  ;;  %v1633_v6 = vmul.f32 %v1625_v22, %v4259_v3  ;;  %1966 = vrot.lane.b32.xlu1 %v4788_v31, %s3150_s5  ;;  %1916 = vrot.lane.b32.xlu0 %v3924_v7, %s3151_s20  ;;  %v4792_v20 = vld [vmem:[#allocation36_spill] sm:$0xff] }
 0x30e   : > { %v1641_v14 = vadd.f32 %v1633_v6, %v1585_v38  ;;  %v1653_v35 = vpop.permute.xlu1 %1652  ;;  %v1758_v12 = vpop.permute.xlu0 %1757  ;;  %v4793_v6 = vld [vmem:[#allocation32_spill] sm:$0xff] }
 0x30f   : > { %v1773_v26 = vsel %vm4001_vm0, %v1758_v12, %v1742_v62  ;;  %v4794_v12 = vld [vmem:[#allocation38_spill] sm:$0xff] }
 0x310   : > { %2450 = vst [vmem:[%s4034_s29 + $0x78] sm:$0xff] %v1641_v14  ;;  %v1781_v37 = vmul.f32 %v1773_v26, %v4012_v39  ;;  %1982 = vrot.lane.b32.xlu1 %v4788_v31, %s3151_s20  ;;  %1968 = vrot.lane.b32.xlu0 %v4790_v24, %s3150_s5  ;;  %v1797_v14 = vmul.f32 %v4006_v49, %v4793_v6 }
 0x312   : > { %v1789_v34 = vadd.f32 %v1781_v37, %v1733_v56  ;;  %v1669_v29 = vpop.permute.xlu1 %1668  ;;  %v1806_v43 = vpop.permute.xlu0 %1805 }
 0x313   : > { %v1683_v28 = vsel %vm4001_vm0, %v1669_v29, %v1653_v35 }
 0x314   : > { %2467 = vst [vmem:[%s4034_s29 + $0x80] sm:$0xff] %v1789_v34  ;;  %v1691_v30 = vmul.f32 %v1683_v28, %v4027_v42  ;;  %1902 = vrot.lane.b32.xlu1 %v4792_v20, %s3150_s5  ;;  %1984 = vrot.lane.b32.xlu0 %v4790_v24, %s3151_s20  ;;  %v4795_v34 = vld [vmem:[#allocation34_spill] sm:$0xff]  ;;  %v4796_v28 = vld [vmem:[#allocation39_spill] sm:$0xff] }
 0x315   : > { %v1734_v29 = vmul.f32 %v4024_v40, %v4795_v34 }
 0x316   : > { %v1699_v44 = vadd.f32 %v1691_v30, %v1643_v33  ;;  %v1744_v62 = vpop.permute.xlu1 %1743  ;;  %v1822_v22 = vpop.permute.xlu0 %1821 }
 0x317   : > { %v1837_v38 = vsel %vm4001_vm0, %v1822_v22, %v1806_v43 }
 0x318   : > { %2452 = vst [vmem:[%s4057_s10 + $0x48] sm:$0xff] %v1699_v44  ;;  %v1845_v35 = vmul.f32 %v1837_v38, %v4012_v39  ;;  %1918 = vrot.lane.b32.xlu1 %v4792_v20, %s3151_s20  ;;  %1904 = vrot.lane.b32.xlu0 %v4794_v12, %s3150_s5  ;;  %v4797_v38 = vld [vmem:[#allocation41_spill] sm:$0xff] }
 0x31a   : > { %v1853_v26 = vadd.f32 %v1845_v35, %v1797_v14  ;;  %v1760_v19 = vpop.permute.xlu1 %1759  ;;  %v1655_v56 = vpop.permute.xlu0 %1654 }
 0x31b   : > { %v1774_v37 = vsel %vm4001_vm0, %v1760_v19, %v1744_v62  ;;  %v1644_v62 = vmul.f32 %v4086_v60, %v3831_v47  ;;  %v1798_v19 = vmul.f32 %v4024_v40, %v3828_v46 }
 0x31c   : > { %2475 = vst [vmem:[%s4057_s10 + $0x80] sm:$0xff] %v1853_v26  ;;  %v1782_v43 = vmul.f32 %v1774_v37, %v4027_v42  ;;  %1970 = vrot.lane.b32.xlu1 %v4796_v28, %s3150_s5  ;;  %1920 = vrot.lane.b32.xlu0 %v4794_v12, %s3151_s20  ;;  %v4799_v37 = vld [vmem:[#allocation42_spill] sm:$0xff] }
 0x31e   : > { %v1790_v27 = vadd.f32 %v1782_v43, %v1734_v29  ;;  %v1808_v33 = vpop.permute.xlu1 %1807  ;;  %v1671_v30 = vpop.permute.xlu0 %1670 }
 0x31f   : > { %v1684_v44 = vsel %vm4001_vm0, %v1671_v30, %v1655_v56  ;;  %v4798_v56 = vld [vmem:[#allocation40_spill] sm:$0xff] }
 0x320   : > { %2468 = vst [vmem:[%s4034_s29 + $0x88] sm:$0xff] %v1790_v27  ;;  %v1692_v22 = vmul.f32 %v1684_v44, %v4089_v61  ;;  %1986 = vrot.lane.b32.xlu1 %v4796_v28, %s3151_s20  ;;  %1972 = vrot.lane.b32.xlu0 %v4797_v38, %s3150_s5 }
 0x322   : > { %v1700_v6 = vadd.f32 %v1692_v22, %v1644_v62  ;;  %v1824_v14 = vpop.permute.xlu1 %1823  ;;  %v1746_v35 = vpop.permute.xlu0 %1745 }
 0x323   : > { %v1838_v26 = vsel %vm4001_vm0, %v1824_v14, %v1808_v33  ;;  %v1735_v33 = vmul.f32 %v4086_v60, %v3833_v48  ;;  %v4800_v14 = vld [vmem:[#allocation43_spill] sm:$0xff] }
 0x324   : > { %2453 = vst [vmem:[%s4057_s10 + $0x50] sm:$0xff] %v1700_v6  ;;  %v1846_v47 = vmul.f32 %v1838_v26, %v4027_v42  ;;  %1906 = vrot.lane.b32.xlu1 %v4798_v56, %s3150_s5  ;;  %1908 = vrot.lane.b32.xlu0 %v4799_v37, %s3150_s5  ;;  %v1645_v6 = vmul.f32 %v4112_v32, %v3842_v51 }
 0x326   : > { %v1854_v34 = vadd.f32 %v1846_v47, %v1798_v19  ;;  %v1657_v29 = vpop.permute.xlu1 %1656  ;;  %v1762_v43 = vpop.permute.xlu0 %1761 }
 0x327   : > { %v1775_v27 = vsel %vm4001_vm0, %v1762_v43, %v1746_v35 }
 0x328   : > { %2476 = vst [vmem:[%s4057_s10 + $0x88] sm:$0xff] %v1854_v34  ;;  %v1783_v46 = vmul.f32 %v1775_v27, %v4089_v61  ;;  %1922 = vrot.lane.b32.xlu1 %v4798_v56, %s3151_s20  ;;  %1924 = vrot.lane.b32.xlu0 %v4799_v37, %s3151_s20  ;;  %v1799_v34 = vmul.f32 %v4086_v60, %v3839_v50 }
 0x32a   : > { %v1791_v30 = vadd.f32 %v1783_v46, %v1735_v33  ;;  %v1673_v44 = vpop.permute.xlu1 %1672  ;;  %v1810_v62 = vpop.permute.xlu0 %1809 }
 0x32b   : > { %v1685_v22 = vsel %vm4001_vm0, %v1673_v44, %v1657_v29  ;;  %v4801_v29 = vld [vmem:[#allocation44_spill] sm:$0xff] }
 0x32c   : > { %2469 = vst [vmem:[%s4034_s29 + $0x90] sm:$0xff] %v1791_v30  ;;  %v1693_v48 = vmul.f32 %v1685_v22, %v4115_v10  ;;  %1974 = vrot.lane.b32.xlu1 %v4800_v14, %s3150_s5  ;;  %1988 = vrot.lane.b32.xlu0 %v4797_v38, %s3151_s20  ;;  %v1736_v30 = vmul.f32 %v4112_v32, %v3844_v0 }
 0x32e   : > { %v1701_v35 = vadd.f32 %v1693_v48, %v1645_v6  ;;  %v1748_v26 = vpop.permute.xlu1 %1747  ;;  %v1826_v19 = vpop.permute.xlu0 %1825  ;;  %v1646_v48 = vmul.f32 %v4148_v15, %v3853_v53 }
 0x32f   : > { %v1839_v47 = vsel %vm4001_vm0, %v1826_v19, %v1810_v62 }
 0x330   : > { %2454 = vst [vmem:[%s4057_s10 + $0x58] sm:$0xff] %v1701_v35  ;;  %v1847_v51 = vmul.f32 %v1839_v47, %v4089_v61  ;;  %1910 = vrot.lane.b32.xlu1 %v4801_v29, %s3150_s5 }
 0x332   : > { %v1855_v43 = vadd.f32 %v1847_v51, %v1799_v34  ;;  %v1764_v27 = vpop.permute.xlu1 %1763  ;;  %v1659_v33 = vpop.permute.xlu0 %1658  ;;  %v1800_v34 = vmul.f32 %v4112_v32, %v3850_v52 }
 0x333   : > { %v1776_v46 = vsel %vm4001_vm0, %v1764_v27, %v1748_v26 }
 0x334   : > { %2477 = vst [vmem:[%s4057_s10 + $0x90] sm:$0xff] %v1855_v43  ;;  %v1784_v50 = vmul.f32 %v1776_v46, %v4115_v10  ;;  %1926 = vrot.lane.b32.xlu1 %v4801_v29, %s3151_s20  ;;  %v1737_v46 = vmul.f32 %v4148_v15, %v3855_v54 }
 0x336   : > { %v1792_v44 = vadd.f32 %v1784_v50, %v1736_v30  ;;  %v1812_v62 = vpop.permute.xlu1 %1811  ;;  %v1675_v22 = vpop.permute.xlu0 %1674 }
 0x337   : > { %v1686_v6 = vsel %vm4001_vm0, %v1675_v22, %v1659_v33  ;;  %v1647_v22 = vmul.f32 %v4184_v5, %v3864_v58 }
 0x338   : > { %2470 = vst [vmem:[%s4034_s29 + $0x98] sm:$0xff] %v1792_v44  ;;  %v1694_v0 = vmul.f32 %v1686_v6, %v4151_v55  ;;  %1990 = vrot.lane.b32.xlu1 %v4800_v14, %s3151_s20 }
 0x33a   : > { %v1702_v35 = vadd.f32 %v1694_v0, %v1646_v48  ;;  %v1828_v26 = vpop.permute.xlu1 %1827  ;;  %v1750_v19 = vpop.permute.xlu0 %1749 }
 0x33b   : > { %v1840_v47 = vsel %vm4001_vm0, %v1828_v26, %v1812_v62  ;;  %v1801_v26 = vmul.f32 %v4148_v15, %v3861_v57 }
 0x33c   : > { %2455 = vst [vmem:[%s4057_s10 + $0x60] sm:$0xff] %v1702_v35  ;;  %v1848_v53 = vmul.f32 %v1840_v47, %v4115_v10 }
 0x33e   : > { %v1856_v51 = vadd.f32 %v1848_v53, %v1800_v34  ;;  %v1661_v43 = vpop.permute.xlu1 %1660  ;;  %v1766_v27 = vpop.permute.xlu0 %1765 }
 0x33f   : > { %v1777_v33 = vsel %vm4001_vm0, %v1766_v27, %v1750_v19 }
 0x340   : > { %2478 = vst [vmem:[%s4057_s10 + $0x98] sm:$0xff] %v1856_v51  ;;  %v1785_v30 = vmul.f32 %v1777_v33, %v4151_v55  ;;  %v1738_v51 = vmul.f32 %v4184_v5, %v3866_v59 }
 0x342   : > { %v1793_v50 = vadd.f32 %v1785_v30, %v1737_v46  ;;  %v1677_v44 = vpop.permute.xlu1 %1676  ;;  %v1814_v62 = vpop.permute.xlu0 %1813  ;;  %v1648_v30 = vmul.f32 %v4220_v17, %v3875_v2 }
 0x343   : > { %v1687_v52 = vsel %vm4001_vm0, %v1677_v44, %v1661_v43 }
 0x344   : > { %2471 = vst [vmem:[%s4034_s29 + $0xa0] sm:$0xff] %v1793_v50  ;;  %v1695_v6 = vmul.f32 %v1687_v52, %v4187_v18 }
 0x346   : > { %v1703_v48 = vadd.f32 %v1695_v6, %v1647_v22  ;;  %v1752_v0 = vpop.permute.xlu1 %1751  ;;  %v1830_v35 = vpop.permute.xlu0 %1829  ;;  %v1802_v22 = vmul.f32 %v4184_v5, %v3872_v1 }
 0x347   : > { %v1841_v54 = vsel %vm4001_vm0, %v1830_v35, %v1814_v62 }
 0x348   : > { %2456 = vst [vmem:[%s4057_s10 + $0x68] sm:$0xff] %v1703_v48  ;;  %v1849_v19 = vmul.f32 %v1841_v54, %v4151_v55  ;;  %v1739_v54 = vmul.f32 %v4220_v17, %v3877_v63 }
 0x34a   : > { %v1857_v47 = vadd.f32 %v1849_v19, %v1801_v26  ;;  %v1768_v34 = vpop.permute.xlu1 %1767  ;;  %v1663_v53 = vpop.permute.xlu0 %1662 }
 0x34b   : > { %v1778_v58 = vsel %vm4001_vm0, %v1768_v34, %v1752_v0 }
 0x34c   : > { %2479 = vst [vmem:[%s4057_s10 + $0xa0] sm:$0xff] %v1857_v47  ;;  %v1786_v43 = vmul.f32 %v1778_v58, %v4187_v18 }
 0x34e   : > { %v1794_v27 = vadd.f32 %v1786_v43, %v1738_v51  ;;  %v1816_v33 = vpop.permute.xlu1 %1815  ;;  %v1679_v46 = vpop.permute.xlu0 %1678 }
 0x34f   : > { %v1688_v57 = vsel %vm4001_vm0, %v1679_v46, %v1663_v53  ;;  %v1649_v53 = vmul.f32 %v4256_v21, %v3886_v23 }
 0x350   : > { %2472 = vst [vmem:[%s4034_s29 + $0xa8] sm:$0xff] %v1794_v27  ;;  %v1696_v50 = vmul.f32 %v1688_v57, %v4223_v16 }
 0x352   : > { %v1704_v44 = vadd.f32 %v1696_v50, %v1648_v30  ;;  %v1832_v62 = vpop.permute.xlu1 %1831  ;;  %v1754_v52 = vpop.permute.xlu0 %1753 }
 0x353   : > { %v1842_v59 = vsel %vm4001_vm0, %v1832_v62, %v1816_v33  ;;  %v1803_v33 = vmul.f32 %v4220_v17, %v3883_v4 }
 0x354   : > { %2457 = vst [vmem:[%s4057_s10 + $0x70] sm:$0xff] %v1704_v44  ;;  %v1850_v6 = vmul.f32 %v1842_v59, %v4187_v18  ;;  %v1740_v44 = vmul.f32 %v4256_v21, %v3888_v8 }
 0x356   : > { %v1858_v48 = vadd.f32 %v1850_v6, %v1802_v22  ;;  %v1665_v0 = vpop.permute.xlu1 %1664  ;;  %v1770_v35 = vpop.permute.xlu0 %1769  ;;  %v1952_v6 = vmul.f32 %v4006_v49, %v3897_v41 }
 0x357   : > { %v1779_v2 = vsel %vm4001_vm0, %v1770_v35, %v1754_v52 }
 0x358   : > { %2480 = vst [vmem:[%s4057_s10 + $0xa8] sm:$0xff] %v1858_v48  ;;  %v1787_v26 = vmul.f32 %v1779_v2, %v4223_v16 }
 0x35a   : > { %v1795_v19 = vadd.f32 %v1787_v26, %v1739_v54  ;;  %v1681_v47 = vpop.permute.xlu1 %1680  ;;  %v1818_v34 = vpop.permute.xlu0 %1817  ;;  %v1804_v54 = vmul.f32 %v4256_v21, %v3894_v11 }
 0x35b   : > { %v1689_v1 = vsel %vm4001_vm0, %v1681_v47, %v1665_v0 }
 0x35c   : > { %2473 = vst [vmem:[%s4034_s29 + $0xb0] sm:$0xff] %v1795_v19  ;;  %v1697_v58 = vmul.f32 %v1689_v1, %v4259_v3  ;;  %v1888_v1 = vmul.f32 %v4006_v49, %v3904_v13 }
 0x35e   : > { %v1705_v51 = vadd.f32 %v1697_v58, %v1649_v53  ;;  %v1756_v43 = vpop.permute.xlu1 %1755  ;;  %v1834_v27 = vpop.permute.xlu0 %1833 }
 0x35f   : > { %v1843_v63 = vsel %vm4001_vm0, %v1834_v27, %v1818_v34  ;;  %v1953_v27 = vmul.f32 %v4024_v40, %v3907_v25 }
 0x360   : > { %2458 = vst [vmem:[%s4057_s10 + $0x78] sm:$0xff] %v1705_v51  ;;  %v1851_v46 = vmul.f32 %v1843_v63, %v4223_v16 }
 0x362   : > { %v1859_v57 = vadd.f32 %v1851_v46, %v1803_v33  ;;  %v1772_v30 = vpop.permute.xlu1 %1771  ;;  %v1961_v50 = vpop.permute.xlu0 %1960 }
 0x363   : > { %v1780_v23 = vsel %vm4001_vm0, %v1772_v30, %v1756_v43 }
 0x364   : > { %2481 = vst [vmem:[%s4057_s10 + $0xb0] sm:$0xff] %v1859_v57  ;;  %v1788_v62 = vmul.f32 %v1780_v23, %v4259_v3 }
 0x366   : > { %v1796_v52 = vadd.f32 %v1788_v62, %v1740_v44  ;;  %v1820_v59 = vpop.permute.xlu1 %1819  ;;  %v1977_v22 = vpop.permute.xlu0 %1976  ;;  %v1889_v44 = vmul.f32 %v4024_v40, %v3914_v36 }
 0x367   : > { %v1992_v4 = vsel %vm4001_vm0, %v1977_v22, %v1961_v50 }
 0x368   : > { %2474 = vst [vmem:[%s4034_s29 + $0xb8] sm:$0xff] %v1796_v52  ;;  %v2000_v48 = vmul.f32 %v1992_v4, %v4012_v39  ;;  %v1890_v4 = vmul.f32 %v4086_v60, %v3924_v7 }
 0x36a   : > { %v2008_v0 = vadd.f32 %v2000_v48, %v1952_v6  ;;  %v1836_v35 = vpop.permute.xlu1 %1835  ;;  %v1897_v2 = vpop.permute.xlu0 %1896 }
 0x36b   : > { %v1844_v8 = vsel %vm4001_vm0, %v1836_v35, %v1820_v59 }
 0x36c   : > { %2499 = vst [vmem:[%s4057_s10 + $0xc0] sm:$0xff] %v2008_v0  ;;  %v1852_v26 = vmul.f32 %v1844_v8, %v4259_v3 }
 0x36e   : > { %v1860_v19 = vadd.f32 %v1852_v26, %v1804_v54  ;;  %v1963_v47 = vpop.permute.xlu1 %1962  ;;  %v1913_v34 = vpop.permute.xlu0 %1912 }
 0x36f   : > { %v1928_v41 = vsel %vm4001_vm0, %v1913_v34, %v1897_v2  ;;  %v1891_v34 = vmul.f32 %v4112_v32, %v4792_v20 }
 0x370   : > { %2482 = vst [vmem:[%s4057_s10 + $0xb8] sm:$0xff] %v1860_v19  ;;  %v1936_v53 = vmul.f32 %v1928_v41, %v4012_v39  ;;  %v1954_v39 = vmul.f32 %v4086_v60, %v3917_v45  ;;  %v1956_v60 = vmul.f32 %v4148_v15, %v4790_v24 }
 0x372   : > { %v1944_v58 = vadd.f32 %v1936_v53, %v1888_v1  ;;  %v1979_v51 = vpop.permute.xlu1 %1978  ;;  %v1965_v43 = vpop.permute.xlu0 %1964 }
 0x373   : > { %v1993_v11 = vsel %vm4001_vm0, %v1979_v51, %v1963_v47  ;;  %v1892_v51 = vmul.f32 %v4148_v15, %v4794_v12 }
 0x374   : > { %2491 = vst [vmem:[%s4034_s29 + $0xc0] sm:$0xff] %v1944_v58  ;;  %v2001_v63 = vmul.f32 %v1993_v11, %v4027_v42 }
 0x376   : > { %v2009_v33 = vadd.f32 %v2001_v63, %v1953_v27  ;;  %v1899_v46 = vpop.permute.xlu1 %1898  ;;  %v1981_v57 = vpop.permute.xlu0 %1980 }
 0x377   : > { %v1994_v13 = vsel %vm4001_vm0, %v1981_v57, %v1965_v43 }
 0x378   : > { %2500 = vst [vmem:[%s4057_s10 + $0xc8] sm:$0xff] %v2009_v33  ;;  %v2002_v49 = vmul.f32 %v1994_v13, %v4089_v61 }
 0x37a   : > { %v2010_v30 = vadd.f32 %v2002_v49, %v1954_v39  ;;  %v1915_v50 = vpop.permute.xlu1 %1914  ;;  %v1901_v23 = vpop.permute.xlu0 %1900  ;;  %v1894_v39 = vmul.f32 %v4220_v17, %v4799_v37 }
 0x37b   : > { %v1929_v25 = vsel %vm4001_vm0, %v1915_v50, %v1899_v46 }
 0x37c   : > { %2501 = vst [vmem:[%s4057_s10 + $0xd0] sm:$0xff] %v2010_v30  ;;  %v1937_v62 = vmul.f32 %v1929_v25, %v4027_v42  ;;  %v1955_v42 = vmul.f32 %v4112_v32, %v4788_v31 }
 0x37e   : > { %v1945_v52 = vadd.f32 %v1937_v62, %v1889_v44  ;;  %v1967_v59 = vpop.permute.xlu1 %1966  ;;  %v1917_v22 = vpop.permute.xlu0 %1916 }
 0x37f   : > { %v1930_v45 = vsel %vm4001_vm0, %v1917_v22, %v1901_v23  ;;  %v1895_v22 = vmul.f32 %v4256_v21, %v4801_v29 }
 0x380   : > { %2492 = vst [vmem:[%s4034_s29 + $0xc8] sm:$0xff] %v1945_v52  ;;  %v1938_v6 = vmul.f32 %v1930_v45, %v4089_v61  ;;  %v1958_v52 = vmul.f32 %v4220_v17, %v4797_v38 }
 0x382   : > { %v1946_v48 = vadd.f32 %v1938_v6, %v1890_v4  ;;  %v1983_v0 = vpop.permute.xlu1 %1982  ;;  %v1969_v35 = vpop.permute.xlu0 %1968 }
 0x383   : > { %v1995_v40 = vsel %vm4001_vm0, %v1983_v0, %v1967_v59 }
 0x384   : > { %2493 = vst [vmem:[%s4034_s29 + $0xd0] sm:$0xff] %v1946_v48  ;;  %v2003_v36 = vmul.f32 %v1995_v40, %v4115_v10 }
 0x386   : > { %v2011_v2 = vadd.f32 %v2003_v36, %v1955_v42  ;;  %v1903_v8 = vpop.permute.xlu1 %1902  ;;  %v1985_v54 = vpop.permute.xlu0 %1984 }
 0x387   : > { %v1996_v7 = vsel %vm4001_vm0, %v1985_v54, %v1969_v35 }
 0x388   : > { %2502 = vst [vmem:[%s4057_s10 + $0xd8] sm:$0xff] %v2011_v2  ;;  %v2004_v61 = vmul.f32 %v1996_v7, %v4151_v55 }
 0x38a   : > { %v2012_v26 = vadd.f32 %v2004_v61, %v1956_v60  ;;  %v1919_v19 = vpop.permute.xlu1 %1918  ;;  %v1905_v47 = vpop.permute.xlu0 %1904 }
 0x38b   : > { %v1931_v31 = vsel %vm4001_vm0, %v1919_v19, %v1903_v8 }
 0x38c   : > { %2503 = vst [vmem:[%s4057_s10 + $0xe0] sm:$0xff] %v2012_v26  ;;  %v1939_v41 = vmul.f32 %v1931_v31, %v4115_v10  ;;  %v1957_v10 = vmul.f32 %v4184_v5, %v4796_v28  ;;  %v1893_v28 = vmul.f32 %v4184_v5, %v4798_v56 }
 0x38e   : > { %v1947_v1 = vadd.f32 %v1939_v41, %v1891_v34  ;;  %v1971_v53 = vpop.permute.xlu1 %1970  ;;  %v1921_v24 = vpop.permute.xlu0 %1920 }
 0x38f   : > { %v1932_v58 = vsel %vm4001_vm0, %v1921_v24, %v1905_v47 }
 0x390   : > { %2494 = vst [vmem:[%s4034_s29 + $0xd8] sm:$0xff] %v1947_v1  ;;  %v1940_v43 = vmul.f32 %v1932_v58, %v4151_v55 }
 0x392   : > { %v1948_v11 = vadd.f32 %v1940_v43, %v1892_v51  ;;  %v1987_v27 = vpop.permute.xlu1 %1986  ;;  %v1973_v63 = vpop.permute.xlu0 %1972 }
 0x393   : > { %v1997_v32 = vsel %vm4001_vm0, %v1987_v27, %v1971_v53 }
 0x394   : > { %2495 = vst [vmem:[%s4034_s29 + $0xe0] sm:$0xff] %v1948_v11  ;;  %v2005_v20 = vmul.f32 %v1997_v32, %v4187_v18 }
 0x396   : > { %v2013_v33 = vadd.f32 %v2005_v20, %v1957_v10  ;;  %v1907_v46 = vpop.permute.xlu1 %1906  ;;  %v1909_v57 = vpop.permute.xlu0 %1908 }
 0x398   : > { %2504 = vst [vmem:[%s4057_s10 + $0xe8] sm:$0xff] %v2013_v33 }
 0x39a   : > { %v1923_v15 = vpop.permute.xlu1 %1922  ;;  %v1925_v55 = vpop.permute.xlu0 %1924 }
 0x39b   : > { %v1933_v12 = vsel %vm4001_vm0, %v1923_v15, %v1907_v46  ;;  %v1934_v13 = vsel %vm4001_vm0, %v1925_v55, %v1909_v57 }
 0x39c   : > { %v1941_v49 = vmul.f32 %v1933_v12, %v4187_v18  ;;  %v1942_v30 = vmul.f32 %v1934_v13, %v4223_v16 }
 0x39e   : > { %v1949_v50 = vadd.f32 %v1941_v49, %v1893_v28  ;;  %v1950_v23 = vadd.f32 %v1942_v30, %v1894_v39  ;;  %v1975_v25 = vpop.permute.xlu1 %1974  ;;  %v1989_v44 = vpop.permute.xlu0 %1988 }
 0x39f   : > { %v1998_v62 = vsel %vm4001_vm0, %v1989_v44, %v1973_v63 }
 0x3a0   : > { %2496 = vst [vmem:[%s4034_s29 + $0xe8] sm:$0xff] %v1949_v50  ;;  %2497 = vst [vmem:[%s4034_s29 + $0xf0] sm:$0xff] %v1950_v23  ;;  %v2006_v5 = vmul.f32 %v1998_v62, %v4223_v16  ;;  %v1959_v16 = vmul.f32 %v4256_v21, %v4800_v14 }
 0x3a2   : > { %v2014_v18 = vadd.f32 %v2006_v5, %v1958_v52  ;;  %v1911_v56 = vpop.permute.xlu1 %1910 }
 0x3a4   : > { %2505 = vst [vmem:[%s4057_s10 + $0xf0] sm:$0xff] %v2014_v18 }
 0x3a6   : > { %v1927_v37 = vpop.permute.xlu1 %1926 }
 0x3a7   : > { %v1935_v59 = vsel %vm4001_vm0, %v1927_v37, %v1911_v56 }
 0x3a8   : > { %v1943_v45 = vmul.f32 %v1935_v59, %v4259_v3 }
 0x3aa   : > { %v1951_v17 = vadd.f32 %v1943_v45, %v1895_v22  ;;  %v1991_v38 = vpop.permute.xlu1 %1990 }
 0x3ab   : > { %v1999_v4 = vsel %vm4001_vm0, %v1991_v38, %v1975_v25 }
 0x3ac   : > { %2498 = vst [vmem:[%s4034_s29 + $0xf8] sm:$0xff] %v1951_v17  ;;  %v2007_v6 = vmul.f32 %v1999_v4, %v4259_v3 }
 0x3ae   : > { %v2015_v48 = vadd.f32 %v2007_v6, %v1959_v16 }
 0x3b0   : > { %2506 = vst [vmem:[%s4057_s10 + $0xf8] sm:$0xff] %v2015_v48 }
 0x3b1   : > { %s4802_s2 = sld [smem:[#allocation25_spill]]  ;;  %s4803_s16 = sld [smem:[#allocation26_spill]] }
 0x3b2   : > { %s2088_s8 = sshll.u32 %s4034_s29, 4  ;;  %s4804_s7 = sld [smem:[#allocation49_spill]]  ;;  %s2089_s8 = int_to_ptr.vmem [resolvable:$true] %s2088_s8 }
 0x3b3   : > { %s3152_s21 = smov 1024   ;;  %p4805_p9 = scmp.ne.s32.totalorder %s4756_s15, 0 }
 0x3b4   : > { %s3153_s5 = smov 2048   ;;  %s3154_s20 = smov 8  }
 0x3b5   : > { %2733 = sst [smem:[#allocation14]] (%p4805_p9), %s3152_s21  ;;  %s3155_s3 = smov 128  }
 0x3b6   : > { %2734 = sst [smem:[#allocation14 + $0x1]] (%p4805_p9), %s3153_s5  ;;  %s3156_s29 = smov [#allocation13]  }
 0x3b7   : > { %s2518_s0 = sshll.u32 %s4802_s2, 3  ;;  %s2519_s6 = sshll.u32 %s4803_s16, 6 }
 0x3b8   : > { %s2069_s1 = sadd.s32 %s2519_s6, %s2518_s0  ;;  %2735 = sst [smem:[#allocation14 + $0x2]] (%p4805_p9), %s3154_s20 }
 0x3b9   : > { %s4592_s14 = sshll.u32 %s2069_s1, 7  ;;  %2736 = sst [smem:[#allocation14 + $0x3]] (%p4805_p9), %s3155_s3 }
 0x3ba   : > { %s2071_s18 = scalar_lea.hbm %s4804_s7, %s4592_s14  ;;  %2737 = sst [smem:[#allocation14 + $0x4]] (%p4805_p9), %s3155_s3 }
 0x3bb   : > { %2738 = sst [smem:[#allocation14 + $0x5]] (%p4805_p9), %s3154_s20  ;;  %s3157_s2 = smov 0  }
 0x3bc   : > { %2739 = dma.general (%p4805_p9), %s2089_s8, 4096, %s2071_s18, %s2044_s12, %s3156_s29, [#allocation14], %s3157_s2, 0  }
 0x3bd   : > { %s4806_s6 = sld [smem:[#allocation50_spill]]  ;;  %s2138_s19 = sshll.u32 %s4057_s10, 4  ;;  %s2139_s19 = int_to_ptr.vmem [resolvable:$true] %s2138_s19 }
 0x3be   : > { %s3158_s23 = smov 1024   ;;  %s3159_s12 = smov 2048  }
 0x3bf   : > { %2740 = sst [smem:[#allocation16]] (%p4805_p9), %s3158_s23  ;;  %s3160_s8 = smov 8  }
 0x3c0   : > { %2741 = sst [smem:[#allocation16 + $0x1]] (%p4805_p9), %s3159_s12  ;;  %s3161_s7 = smov 128  }
 0x3c1   : > { %2742 = sst [smem:[#allocation16 + $0x2]] (%p4805_p9), %s3160_s8  ;;  %s3162_s18 = smov [#allocation15]  }
 0x3c2   : > { %2743 = sst [smem:[#allocation16 + $0x3]] (%p4805_p9), %s3161_s7  ;;  %s3163_s21 = smov 0  }
 0x3c3   : > { %s2121_s1 = scalar_lea.hbm %s4806_s6, %s4592_s14  ;;  %2744 = sst [smem:[#allocation16 + $0x4]] (%p4805_p9), %s3161_s7 }
 0x3c4   : > { %2745 = sst [smem:[#allocation16 + $0x5]] (%p4805_p9), %s3160_s8 }
 0x3c5   : > { %2746 = dma.general (%p4805_p9), %s2139_s19, 4096, %s2121_s1, %s4587_s17, %s3162_s18, [#allocation16], %s3163_s21, 0  }
 0x3c6   : > { %s4807_s20 = sld [smem:[#allocation51_spill]]  ;;  %s2188_s29 = sshll.u32 %s3723_s22, 4  ;;  %s2189_s29 = int_to_ptr.vmem [resolvable:$true] %s2188_s29 }
 0x3c7   : > { %s3164_s2 = smov 1024   ;;  %s3165_s16 = smov 2048  }
 0x3c8   : > { %2747 = sst [smem:[#allocation18]] (%p4805_p9), %s3164_s2  ;;  %s3166_s0 = smov 8  }
 0x3c9   : > { %2748 = sst [smem:[#allocation18 + $0x1]] (%p4805_p9), %s3165_s16  ;;  %s3167_s6 = smov 128  }
 0x3ca   : > { %2749 = sst [smem:[#allocation18 + $0x2]] (%p4805_p9), %s3166_s0  ;;  %s3168_s1 = smov [#allocation17]  }
 0x3cb   : > { %2750 = sst [smem:[#allocation18 + $0x3]] (%p4805_p9), %s3167_s6 }
 0x3cc   : > { %s2171_s3 = scalar_lea.hbm %s4807_s20, %s4592_s14  ;;  %2751 = sst [smem:[#allocation18 + $0x4]] (%p4805_p9), %s3167_s6 }
 0x3cd   : > { %2752 = sst [smem:[#allocation18 + $0x5]] (%p4805_p9), %s3166_s0  ;;  %s3169_s14 = smov 0  }
 0x3ce   : > { %2753 = dma.general (%p4805_p9), %s2189_s29, 4096, %s2171_s3, %s4587_s17, %s3168_s1, [#allocation18], %s3169_s14, 0  }
 0x3cf PF: > { %p2784_p3 = scmp.ge.s32.totalorder %s3139_s11, 2  ;;  %s2216_s22 = sand.u32 1, %s3111_s27  }
 0x3d0   : > { %p4808_p11 = scmp.ne.s32.totalorder %s4757_s24, 0  ;;  %s2217_s19 = scalar_lea.sflag [#allocation4], %s2216_s22 }
 0x3d2   : > { %p2772_p0 = pnand %p2784_p3, %p4808_p11 }
 0x3d4   : > { %3090 = dma.done.wait (!%p2772_p0), %s2217_s19, 4096  }
 0x3d5   : > { %3092 = vsyncadd (!%p2772_p0), %s2217_s19, 4294963200  ;;  %s4809_s23 = sadd.s32 4294967294, %s3139_s11  }
 0x3d6   : > { %s2225_s12 = sand.u32 1, %s4809_s23  }
 0x3d7   : > { %s2226_s8 = scalar_lea.sflag [#allocation11], %s2225_s12 }
 0x3d8   : > { %3094 = dma.done.wait (!%p2772_p0), %s2226_s8, 8192  }
 0x3d9   : > { %3096 = vsyncadd (!%p2772_p0), %s2226_s8, 4294959104  ;;  %s28_s11 = sadd.s32 1, %s3139_s11   ;;  %s4810_s15 = sld [smem:[#allocation24_spill]] }
 0x3da   : > { %p25_p13 = scmp.ge.s32.totalorder %s28_s11, 6   ;;  %s4811_s29 = sld [smem:[#allocation30_spill]] }
 0x3db   : > { %s4812_s8 = sld [smem:[#allocation27_spill]]  ;;  %s4813_s17 = sld [smem:[#allocation28_spill]] }
 0x3dc   : > { %s4814_s10 = sld [smem:[#allocation29_spill]]  ;;  %s4815_s24 = smov %s3103_s25 }
 0x3dd   : > { %s4816_s25 = smov %s3107_s26  ;;  %s4817_s26 = smov %s3354_s30 }
 0x3de   : > { %s4818_s27 = smov %s3115_s28  ;;  %s4820_s30 = smov %s3131_s9 }
 0x3df   : > { %s4819_s28 = smov %s4810_s15  ;;  %27 = sbr.rel (!%p25_p13) target bundleno = 20 (0x14), region = 168 }
 0x3e1   : > { %s4821_s9 = smov %s4813_s17 }
 0x3e6   :  { %2240 = vsyncpa [#allocation3], 1 }
 0x3e7   :  { %2242 = vsyncpa [#allocation3 + $0x1], 1 }
 0x3e8   :  { %2243 = vsyncpa [#allocation6], 1 }
 0x3e9   :  { %2244 = vsyncpa [#allocation4], 1 }
 0x3ea   :  { %2246 = vsyncpa [#allocation4 + $0x1], 1 }
 0x3eb   :  { %2247 = vsyncpa [#allocation11], 1 }
 0x3ec   :  { %2249 = vsyncpa [#allocation11 + $0x1], 1 }

</bundles_post_ra>
